<compile_context>
chip_gen: v6e
topology: v6e:2x2x1
jax: 0.10.0
libtpu: 0.0.40
codegen_flags: <defaults>
</compile_context>

<pallas_src>
import functools

import jax
import jax.numpy as jnp
from jax import lax
from jax.experimental import pallas as pl
from jax.experimental.pallas import tpu as pltpu

EPS = 1e-5          # nn.LayerNorm default eps
SUBLANE = 16        # batch-row granularity (bf16 sublane packing)
LANE = 128


def _round_up(x, m):
    return ((x + m - 1) // m) * m


def _cdiv(a, b):
    return -(-a // b)


def _layernorm(x, gamma, beta):
    """Plain LayerNorm over the last axis (wrapper / reference path, unpadded)."""
    mu = jnp.mean(x, axis=-1, keepdims=True)
    var = jnp.mean((x - mu) ** 2, axis=-1, keepdims=True)
    return (x - mu) * lax.rsqrt(var + EPS) * gamma + beta


def _masked_layernorm(x, gamma, beta, n_valid):
    """LayerNorm over the first `n_valid` lanes of a lane-padded tensor.

    Padded lanes produce 0 in the output (gamma/beta are zero-padded), so padding
    never leaks into downstream matmuls.
    """
    mask = lax.broadcasted_iota(jnp.int32, x.shape, x.ndim - 1) < n_valid
    xm = jnp.where(mask, x, 0.0)
    mu = jnp.sum(xm, axis=-1, keepdims=True) * (1.0 / n_valid)
    d = jnp.where(mask, x - mu, 0.0)
    var = jnp.sum(d * d, axis=-1, keepdims=True) * (1.0 / n_valid)
    return d * lax.rsqrt(var + EPS) * gamma + beta


def rnnlm_kernel(H, V,                              # static real (unpadded) sizes
                 emb_ref, w_ih0_ref, b0_ref, w_hh0_ref, w1_ref, b1_ref,
                 gam_o_ref, bet_o_ref, w_fc_ref, b_fc_ref, h0_ref,
                 logp_ref, hid_ref, pre0_ref):
    t_idx = pl.program_id(1)
    t_last = pl.num_programs(1) - 1
    T_blk, Bb, _ = emb_ref.shape

    # First T-chunk of this batch block: load the initial hidden state into the
    # hidden-output block, which stays VMEM-resident across the whole T axis.
    @pl.when(t_idx == 0)
    def _():
        hid_ref[...] = h0_ref[...]

    # ---- hoisted input path for this chunk: LN already folded into the embedding
    # table in the wrapper; one bf16 MXU GEMM for all T_blk steps + fused bias ----
    x = emb_ref[...].reshape(T_blk * Bb, -1)                  # bf16, tile-aligned merge
    pre0 = jnp.dot(x, w_ih0_ref[...],
                   preferred_element_type=jnp.float32) + b0_ref[...]
    pre0_chunk = pre0.reshape(T_blk, Bb, -1)

    w_hh0 = w_hh0_ref[...]        # f32: keeps the serial path free of per-step casts
    w1 = w1_ref[...]              # stacked [W_ih1; W_hh1]  (2*Hp, Hp), f32
    b1 = b1_ref[...]

    h1 = hid_ref[0]
    h2 = hid_ref[1]

    # TODO(synk): keep W_hh0 / w1 resident in the MXU across steps via
    # pltpu.matmul_push_rhs / matmul_acc_lhs / matmul_pop (per-MXU placement on
    # v6e/v7x) to remove the per-step RHS reload from the serial chain.
    def step_with(pre_t, h1, h2):
        h1 = jnp.tanh(pre_t + jnp.dot(h1, w_hh0,
                                      preferred_element_type=jnp.float32))
        lhs = jnp.concatenate([h1, h2], axis=-1)              # (Bb, 2*Hp)
        h2 = jnp.tanh(jnp.dot(lhs, w1, preferred_element_type=jnp.float32) + b1)
        return h1, h2

    if T_blk <= 16:
        # Small static chunk: fully unrolled so the LLO scheduler can overlap MXU
        # pops / tanh with the next step's pushes.
        for t in range(T_blk):
            h1, h2 = step_with(pre0_chunk[t], h1, h2)
    else:
        # Larger chunks: bound vreg live ranges with fori_loop over a VMEM scratch.
        pre0_ref[...] = pre0_chunk

        def body(t, carry):
            h1, h2 = carry
            return step_with(pre0_ref[t], h1, h2)

        h1, h2 = lax.fori_loop(0, T_blk, body, (h1, h2), unroll=2)

    hid_ref[0] = h1
    hid_ref[1] = h2

    # ---- final LayerNorm + FC + log_softmax only on the last T chunk ----
    @pl.when(t_idx == t_last)
    def _():
        out_last = _masked_layernorm(h2, gam_o_ref[...], bet_o_ref[...], H)
        # dropout_rnn_output: identity in eval mode
        logits = jnp.dot(out_last.astype(jnp.bfloat16), w_fc_ref[...],
                         preferred_element_type=jnp.float32) + b_fc_ref[...]
        vmask = lax.broadcasted_iota(jnp.int32, logits.shape, 1) < V
        logits = jnp.where(vmask, logits, -1e30)              # f32-safe sentinel
        m = jnp.max(logits, axis=-1, keepdims=True)
        s = logits - m
        lse = jnp.log(jnp.sum(jnp.where(vmask, jnp.exp(s), 0.0),
                              axis=-1, keepdims=True))
        logp_ref[...] = s - lse
        # TODO(synk): for very large V, stream w_fc over a V grid axis with an online
        # (running max/sum) log-softmax instead of keeping it fully resident.


def _is_multi_tensorcore():
    """Best-effort: chips whose single device exposes >1 TensorCore."""
    try:
        kind = jax.devices()[0].device_kind.lower()
    except Exception:
        return False
    return any(tag in kind for tag in ("v4", "v5p", "v7"))


def _vmem_limit_bytes():
    """Derive the scoped-VMEM limit from the chip instead of hard-coding 32 MiB."""
    try:
        phys = getattr(pltpu.get_tpu_info(), "vmem_capacity_bytes", None)
    except Exception:
        phys = None
    if not phys:
        phys = 64 * 1024 * 1024                    # conservative (v7x per-TC VMEM)
    return int(min(phys - 8 * 1024 * 1024, 100 * 1024 * 1024))


def _pick_batch_block(B, multi_core):
    """Balanced batch blocks (<=128 rows); even #blocks on multi-TC chips."""
    Bg = _round_up(max(B, 1), SUBLANE)
    n_blocks = max(1, _cdiv(Bg, 128))
    if multi_core and n_blocks % 2 == 1 and Bg >= 2 * SUBLANE:
        n_blocks += 1                              # >=2 'parallel' steps -> both cores
    B_blk = _round_up(_cdiv(Bg, n_blocks), SUBLANE)
    return B_blk, B_blk * n_blocks


def _pick_t_block(T, limit=32):
    """Largest divisor of T <= limit (no padding of the time axis is allowed)."""
    if T <= limit:
        return T
    for d in range(limit, 0, -1):
        if T % d == 0:
            return d
    return 1


def rnnlm_forward(params, input_seq, hidden):
    """Pallas implementation of RNNLM.forward (eval mode: dropouts are identity)."""
    B, T = input_seq.shape
    V, E = params['embedding'].shape
    H = params['w_hh0'].shape[0]
    L = hidden.shape[0]
    assert L == 2, "kernel implements the module default num_layers=2"

    E_pad = _round_up(E, LANE)
    H_pad = _round_up(H, LANE)
    V_pad = _round_up(V, LANE)
    B_blk, B_pad = _pick_batch_block(B, _is_multi_tensorcore())
    T_blk = _pick_t_block(T)

    # Embedding LayerNorm commutes with the row gather -> fold it into the table,
    # then ship the gathered activations as bf16 (halves the only O(T*B*E) stream).
    table = _layernorm(params['embedding'].astype(jnp.float32),
                       params['gamma_e'], params['beta_e'])
    emb = jnp.take(table, input_seq, axis=0)                  # (B, T, E)  -- glue
    # dropout_emb: identity in eval mode
    emb_t = jnp.transpose(emb, (1, 0, 2))                     # time-major (T, B, E)
    emb_t = jnp.pad(emb_t, ((0, 0), (0, B_pad - B), (0, E_pad - E))
                    ).astype(jnp.bfloat16)

    def pad2(a, r, c):
        return jnp.pad(a, ((0, r - a.shape[0]), (0, c - a.shape[1])))

    w_ih0 = pad2(params['w_ih0'], E_pad, H_pad).astype(jnp.bfloat16)
    b0 = pad2(params['b_ih0'] + params['b_hh0'], 1, H_pad)
    # Recurrent weights stay f32: same MXU cost at these shapes, no per-step casts.
    w_hh0 = pad2(params['w_hh0'], H_pad, H_pad).astype(jnp.float32)
    w1 = jnp.concatenate([pad2(params['w_ih1'], H_pad, H_pad),
                          pad2(params['w_hh1'], H_pad, H_pad)],
                         axis=0).astype(jnp.float32)
    b1 = pad2(params['b_ih1'] + params['b_hh1'], 1, H_pad)
    gam_o = pad2(params['gamma_o'], 1, H_pad)
    bet_o = pad2(params['beta_o'], 1, H_pad)
    w_fc = pad2(params['w_fc'], H_pad, V_pad).astype(jnp.bfloat16)
    b_fc = pad2(params['b_fc'], 1, V_pad)
    hid_pad = jnp.pad(hidden, ((0, 0), (0, B_pad - B), (0, H_pad - H))
                      ).astype(jnp.float32)

    args = (emb_t, w_ih0, b0, w_hh0, w1, b1, gam_o, bet_o, w_fc, b_fc, hid_pad)

    def const_spec(a):
        nd = a.ndim
        # TODO(synk): pipeline_mode=pl.Buffered(1) would single-buffer these
        # constant-index weight blocks and halve their VMEM footprint.
        return pl.BlockSpec(a.shape, lambda i, t, _nd=nd: (0,) * _nd)

    in_specs = [
        pl.BlockSpec((T_blk, B_blk, E_pad), lambda i, t: (t, i, 0)),   # emb chunk
        const_spec(w_ih0), const_spec(b0), const_spec(w_hh0),
        const_spec(w1), const_spec(b1),
        const_spec(gam_o), const_spec(bet_o),
        const_spec(w_fc), const_spec(b_fc),
        pl.BlockSpec((L, B_blk, H_pad), lambda i, t: (0, i, 0)),       # h0
    ]
    out_specs = (
        pl.BlockSpec((B_blk, V_pad), lambda i, t: (i, 0)),             # logp
        pl.BlockSpec((L, B_blk, H_pad), lambda i, t: (0, i, 0)),       # hidden out
    )

    logp_pad, hid_out_pad = pl.pallas_call(
        functools.partial(rnnlm_kernel, H, V),
        out_shape=(jax.ShapeDtypeStruct((B_pad, V_pad), jnp.float32),
                   jax.ShapeDtypeStruct((L, B_pad, H_pad), jnp.float32)),
        grid=(B_pad // B_blk, T // T_blk),
        in_specs=in_specs,
        out_specs=out_specs,
        scratch_shapes=[pltpu.VMEM((T_blk, B_blk, H_pad), jnp.float32)],  # pre0
        input_output_aliases={len(args) - 1: 1},   # hidden in -> hidden out (derived)
        compiler_params=pltpu.CompilerParams(
            dimension_semantics=("parallel", "arbitrary"),
            vmem_limit_bytes=_vmem_limit_bytes()),
    )(*args)

    return logp_pad[:B, :V], hid_out_pad[:, :B, :H]


def rnnlm_reference(params, input_seq, hidden):
    """Pure-JAX f32 reference for numerical validation."""
    emb = jnp.take(params['embedding'], input_seq, axis=0)
    x = _layernorm(emb, params['gamma_e'], params['beta_e'])     # (B, T, E)
    B, T, _ = x.shape
    h1 = hidden[0]
    h2 = hidden[1]
    for t in range(T):
        xt = x[:, t, :]
        h1 = jnp.tanh(xt @ params['w_ih0'] + params['b_ih0']
                      + h1 @ params['w_hh0'] + params['b_hh0'])
        h2 = jnp.tanh(h1 @ params['w_ih1'] + params['b_ih1']
                      + h2 @ params['w_hh1'] + params['b_hh1'])
    out_last = _layernorm(h2, params['gamma_o'], params['beta_o'])
    logits = out_last @ params['w_fc'] + params['b_fc']
    logp = jax.nn.log_softmax(logits, axis=1)
    return logp, jnp.stack([h1, h2], axis=0)


def init_params(key, vocab_size, embedding_dim, hidden_dim):
    ks = jax.random.split(key, 12)
    scale = 0.1
    emb_tab = scale * jax.random.normal(ks[0], (vocab_size, embedding_dim), jnp.float32)
    emb_tab = emb_tab.at[0].set(0.0)  # padding_idx=0
    return {
        'embedding': emb_tab,
        'gamma_e': jnp.ones((1, embedding_dim), jnp.float32),
        'beta_e': jnp.zeros((1, embedding_dim), jnp.float32),
        # layer 0: input -> hidden (stored transposed: (E, H) / (H, H))
        'w_ih0': scale * jax.random.normal(ks[1], (embedding_dim, hidden_dim), jnp.float32),
        'w_hh0': scale * jax.random.normal(ks[2], (hidden_dim, hidden_dim), jnp.float32),
        'b_ih0': scale * jax.random.normal(ks[3], (1, hidden_dim), jnp.float32),
        'b_hh0': scale * jax.random.normal(ks[4], (1, hidden_dim), jnp.float32),
        # layer 1: hidden -> hidden
        'w_ih1': scale * jax.random.normal(ks[5], (hidden_dim, hidden_dim), jnp.float32),
        'w_hh1': scale * jax.random.normal(ks[6], (hidden_dim, hidden_dim), jnp.float32),
        'b_ih1': scale * jax.random.normal(ks[7], (1, hidden_dim), jnp.float32),
        'b_hh1': scale * jax.random.normal(ks[8], (1, hidden_dim), jnp.float32),
        'gamma_o': jnp.ones((1, hidden_dim), jnp.float32),
        'beta_o': jnp.zeros((1, hidden_dim), jnp.float32),
        'w_fc': scale * jax.random.normal(ks[9], (hidden_dim, vocab_size), jnp.float32),
        'b_fc': scale * jax.random.normal(ks[10], (1, vocab_size), jnp.float32),
    }


if __name__ == "__main__":
    VOCAB, EMB, HID, LAYERS = 64, 32, 32, 2
    B, T = 2, 8

    key = jax.random.PRNGKey(0)
    k_param, k_seq = jax.random.split(key)
    params = init_params(k_param, VOCAB, EMB, HID)

    input_seq = jax.random.randint(k_seq, (B, T), 0, VOCAB, dtype=jnp.int32)
    hidden = jnp.zeros((LAYERS, B, HID), jnp.float32)   # init_hidden(batch_size)

    logp, hid_out = jax.jit(rnnlm_forward)(params, input_seq, hidden)
    logp = jax.block_until_ready(logp)
    hid_out = jax.block_until_ready(hid_out)

    # validate against the pure-JAX f32 reference (bf16 input/FC weights -> relaxed tol)
    logp_expect, hid_expect = rnnlm_reference(params, input_seq, hidden)
    assert logp.shape == (B, VOCAB) and hid_out.shape == (LAYERS, B, HID)
    assert jnp.allclose(logp, logp_expect, atol=2e-2, rtol=2e-2)
    assert jnp.allclose(hid_out, hid_expect, atol=2e-2, rtol=2e-2)

    print("KERNEL_OK")
</pallas_src>

<mosaic_0001>
module attributes {stable_mosaic.version = 11 : i64} {
  func.func @rnnlm_kernel(%arg0: i32, %arg1: i32, %arg2: memref<8x16x128xbf16, #tpu.memory_space<vmem>>, %arg3: memref<128x128xbf16, #tpu.memory_space<vmem>>, %arg4: memref<1x128xf32, #tpu.memory_space<vmem>>, %arg5: memref<128x128xf32, #tpu.memory_space<vmem>>, %arg6: memref<256x128xf32, #tpu.memory_space<vmem>>, %arg7: memref<1x128xf32, #tpu.memory_space<vmem>>, %arg8: memref<1x128xf32, #tpu.memory_space<vmem>>, %arg9: memref<1x128xf32, #tpu.memory_space<vmem>>, %arg10: memref<128x128xbf16, #tpu.memory_space<vmem>>, %arg11: memref<1x128xf32, #tpu.memory_space<vmem>>, %arg12: memref<2x16x128xf32, #tpu.memory_space<vmem>>, %arg13: memref<16x128xf32, #tpu.memory_space<vmem>>, %arg14: memref<2x16x128xf32, #tpu.memory_space<vmem>>, %arg15: memref<8x16x128xf32, #tpu.memory_space<vmem>>) attributes {dimension_semantics = [#tpu.dimension_semantics<parallel>, #tpu.dimension_semantics<arbitrary>], iteration_bounds = array<i64: 1, 1>, scalar_prefetch = 0 : i64, scratch_operands = 1 : i64, tpu.core_type = #tpu.core_type<tc>, window_params = [{transform_indices = @transform_0, window_bounds = array<i64: 8, 16, 128>}, {pipeline_mode = #tpu.pipeline_mode<synchronous>, transform_indices = @transform_1, window_bounds = array<i64: 128, 128>}, {pipeline_mode = #tpu.pipeline_mode<synchronous>, transform_indices = @transform_2, window_bounds = array<i64: 1, 128>}, {pipeline_mode = #tpu.pipeline_mode<synchronous>, transform_indices = @transform_3, window_bounds = array<i64: 128, 128>}, {pipeline_mode = #tpu.pipeline_mode<synchronous>, transform_indices = @transform_4, window_bounds = array<i64: 256, 128>}, {pipeline_mode = #tpu.pipeline_mode<synchronous>, transform_indices = @transform_5, window_bounds = array<i64: 1, 128>}, {pipeline_mode = #tpu.pipeline_mode<synchronous>, transform_indices = @transform_6, window_bounds = array<i64: 1, 128>}, {pipeline_mode = #tpu.pipeline_mode<synchronous>, transform_indices = @transform_7, window_bounds = array<i64: 1, 128>}, {pipeline_mode = #tpu.pipeline_mode<synchronous>, transform_indices = @transform_8, window_bounds = array<i64: 128, 128>}, {pipeline_mode = #tpu.pipeline_mode<synchronous>, transform_indices = @transform_9, window_bounds = array<i64: 1, 128>}, {transform_indices = @transform_10, window_bounds = array<i64: 2, 16, 128>}, {transform_indices = @transform_11, window_bounds = array<i64: 16, 128>}, {transform_indices = @transform_12, window_bounds = array<i64: 2, 16, 128>}]} {
    %c0_i32 = arith.constant 0 : i32
    %0 = arith.cmpi eq, %arg1, %c0_i32 : i32
    %1 = arith.extui %0 : i1 to i32
    %c0_i32_0 = arith.constant 0 : i32
    %2 = arith.cmpi ne, %1, %c0_i32_0 : i32
    scf.if %2 {
      %c0_42 = arith.constant 0 : index
      %c0_43 = arith.constant 0 : index
      %c0_44 = arith.constant 0 : index
      %107 = vector.load %arg12[%c0_42, %c0_43, %c0_44] : memref<2x16x128xf32, #tpu.memory_space<vmem>>, vector<2x16x128xf32>
      %c0_45 = arith.constant 0 : index
      %c0_46 = arith.constant 0 : index
      %c0_47 = arith.constant 0 : index
      %108 = vector.load %arg14[%c0_45, %c0_46, %c0_47] : memref<2x16x128xf32, #tpu.memory_space<vmem>>, vector<2x16x128xf32>
      tpu.vector_store %arg14[%c0_45, %c0_46, %c0_47], %107 {strides = array<i32>} : memref<2x16x128xf32, #tpu.memory_space<vmem>>, vector<2x16x128xf32>,
    } else {
    }
    %c0 = arith.constant 0 : index
    %c0_1 = arith.constant 0 : index
    %c0_2 = arith.constant 0 : index
    %3 = vector.load %arg2[%c0, %c0_1, %c0_2] : memref<8x16x128xbf16, #tpu.memory_space<vmem>>, vector<8x16x128xbf16>
    %4 = vector.shape_cast %3 : vector<8x16x128xbf16> to vector<128x128xbf16>
    %c0_3 = arith.constant 0 : index
    %c0_4 = arith.constant 0 : index
    %5 = vector.load %arg3[%c0_3, %c0_4] : memref<128x128xbf16, #tpu.memory_space<vmem>>, vector<128x128xbf16>
    %cst = arith.constant dense<0.000000e+00> : vector<128x128xf32>
    %6 = tpu.matmul %4, %5, %cst {dimension_numbers = #tpu.dot_dimension_numbers<[1], [0], [0], [1], [0, 0, 1, 1], [], []>} : vector<128x128xbf16>, vector<128x128xbf16>, vector<128x128xf32> -> vector<128x128xf32>
    %c0_5 = arith.constant 0 : index
    %c0_6 = arith.constant 0 : index
    %7 = vector.load %arg4[%c0_5, %c0_6] : memref<1x128xf32, #tpu.memory_space<vmem>>, vector<1x128xf32>
    %8 = vector.broadcast %7 : vector<1x128xf32> to vector<128x128xf32>
    %9 = arith.addf %6, %8 : vector<128x128xf32>
    %10 = vector.shape_cast %9 : vector<128x128xf32> to vector<8x16x128xf32>
    %c0_7 = arith.constant 0 : index
    %c0_8 = arith.constant 0 : index
    %11 = vector.load %arg5[%c0_7, %c0_8] : memref<128x128xf32, #tpu.memory_space<vmem>>, vector<128x128xf32>
    %c0_9 = arith.constant 0 : index
    %c0_10 = arith.constant 0 : index
    %12 = vector.load %arg6[%c0_9, %c0_10] : memref<256x128xf32, #tpu.memory_space<vmem>>, vector<256x128xf32>
    %c0_11 = arith.constant 0 : index
    %c0_12 = arith.constant 0 : index
    %13 = vector.load %arg7[%c0_11, %c0_12] : memref<1x128xf32, #tpu.memory_space<vmem>>, vector<1x128xf32>
    %c0_13 = arith.constant 0 : index
    %c0_14 = arith.constant 0 : index
    %c0_15 = arith.constant 0 : index
    %14 = vector.load %arg14[%c0_13, %c0_14, %c0_15] : memref<2x16x128xf32, #tpu.memory_space<vmem>>, vector<1x16x128xf32>
    %15 = vector.shape_cast %14 : vector<1x16x128xf32> to vector<16x128xf32>
    %c1 = arith.constant 1 : index
    %c0_16 = arith.constant 0 : index
    %c0_17 = arith.constant 0 : index
    %16 = vector.load %arg14[%c1, %c0_16, %c0_17] : memref<2x16x128xf32, #tpu.memory_space<vmem>>, vector<1x16x128xf32>
    %17 = vector.shape_cast %16 : vector<1x16x128xf32> to vector<16x128xf32>
    %18 = vector.extract_strided_slice %10 {offsets = [0, 0, 0], sizes = [1, 16, 128], strides = [1, 1, 1]} : vector<8x16x128xf32> to vector<1x16x128xf32>
    %19 = vector.shape_cast %18 : vector<1x16x128xf32> to vector<16x128xf32>
    %cst_18 = arith.constant dense<0.000000e+00> : vector<16x128xf32>
    %20 = tpu.matmul %15, %11, %cst_18 {dimension_numbers = #tpu.dot_dimension_numbers<[1], [0], [0], [1], [0, 0, 1, 1], [], []>} : vector<16x128xf32>, vector<128x128xf32>, vector<16x128xf32> -> vector<16x128xf32>
    %21 = arith.addf %19, %20 : vector<16x128xf32>
    %22 = math.tanh %21 : vector<16x128xf32>
    %23 = tpu.concatenate %22, %17 in 1 : vector<16x128xf32>, vector<16x128xf32> -> vector<16x256xf32>
    %cst_19 = arith.constant dense<0.000000e+00> : vector<16x128xf32>
    %24 = tpu.matmul %23, %12, %cst_19 {dimension_numbers = #tpu.dot_dimension_numbers<[1], [0], [0], [1], [0, 0, 1, 1], [], []>} : vector<16x256xf32>, vector<256x128xf32>, vector<16x128xf32> -> vector<16x128xf32>
    %25 = vector.broadcast %13 : vector<1x128xf32> to vector<16x128xf32>
    %26 = arith.addf %24, %25 : vector<16x128xf32>
    %27 = math.tanh %26 : vector<16x128xf32>
    %28 = vector.extract_strided_slice %10 {offsets = [1, 0, 0], sizes = [1, 16, 128], strides = [1, 1, 1]} : vector<8x16x128xf32> to vector<1x16x128xf32>
    %29 = vector.shape_cast %28 : vector<1x16x128xf32> to vector<16x128xf32>
    %cst_20 = arith.constant dense<0.000000e+00> : vector<16x128xf32>
    %30 = tpu.matmul %22, %11, %cst_20 {dimension_numbers = #tpu.dot_dimension_numbers<[1], [0], [0], [1], [0, 0, 1, 1], [], []>} : vector<16x128xf32>, vector<128x128xf32>, vector<16x128xf32> -> vector<16x128xf32>
    %31 = arith.addf %29, %30 : vector<16x128xf32>
    %32 = math.tanh %31 : vector<16x128xf32>
    %33 = tpu.concatenate %32, %27 in 1 : vector<16x128xf32>, vector<16x128xf32> -> vector<16x256xf32>
    %cst_21 = arith.constant dense<0.000000e+00> : vector<16x128xf32>
    %34 = tpu.matmul %33, %12, %cst_21 {dimension_numbers = #tpu.dot_dimension_numbers<[1], [0], [0], [1], [0, 0, 1, 1], [], []>} : vector<16x256xf32>, vector<256x128xf32>, vector<16x128xf32> -> vector<16x128xf32>
    %35 = vector.broadcast %13 : vector<1x128xf32> to vector<16x128xf32>
    %36 = arith.addf %34, %35 : vector<16x128xf32>
    %37 = math.tanh %36 : vector<16x128xf32>
    %38 = vector.extract_strided_slice %10 {offsets = [2, 0, 0], sizes = [1, 16, 128], strides = [1, 1, 1]} : vector<8x16x128xf32> to vector<1x16x128xf32>
    %39 = vector.shape_cast %38 : vector<1x16x128xf32> to vector<16x128xf32>
    %cst_22 = arith.constant dense<0.000000e+00> : vector<16x128xf32>
    %40 = tpu.matmul %32, %11, %cst_22 {dimension_numbers = #tpu.dot_dimension_numbers<[1], [0], [0], [1], [0, 0, 1, 1], [], []>} : vector<16x128xf32>, vector<128x128xf32>, vector<16x128xf32> -> vector<16x128xf32>
    %41 = arith.addf %39, %40 : vector<16x128xf32>
    %42 = math.tanh %41 : vector<16x128xf32>
    %43 = tpu.concatenate %42, %37 in 1 : vector<16x128xf32>, vector<16x128xf32> -> vector<16x256xf32>
    %cst_23 = arith.constant dense<0.000000e+00> : vector<16x128xf32>
    %44 = tpu.matmul %43, %12, %cst_23 {dimension_numbers = #tpu.dot_dimension_numbers<[1], [0], [0], [1], [0, 0, 1, 1], [], []>} : vector<16x256xf32>, vector<256x128xf32>, vector<16x128xf32> -> vector<16x128xf32>
    %45 = vector.broadcast %13 : vector<1x128xf32> to vector<16x128xf32>
    %46 = arith.addf %44, %45 : vector<16x128xf32>
    %47 = math.tanh %46 : vector<16x128xf32>
    %48 = vector.extract_strided_slice %10 {offsets = [3, 0, 0], sizes = [1, 16, 128], strides = [1, 1, 1]} : vector<8x16x128xf32> to vector<1x16x128xf32>
    %49 = vector.shape_cast %48 : vector<1x16x128xf32> to vector<16x128xf32>
    %cst_24 = arith.constant dense<0.000000e+00> : vector<16x128xf32>
    %50 = tpu.matmul %42, %11, %cst_24 {dimension_numbers = #tpu.dot_dimension_numbers<[1], [0], [0], [1], [0, 0, 1, 1], [], []>} : vector<16x128xf32>, vector<128x128xf32>, vector<16x128xf32> -> vector<16x128xf32>
    %51 = arith.addf %49, %50 : vector<16x128xf32>
    %52 = math.tanh %51 : vector<16x128xf32>
    %53 = tpu.concatenate %52, %47 in 1 : vector<16x128xf32>, vector<16x128xf32> -> vector<16x256xf32>
    %cst_25 = arith.constant dense<0.000000e+00> : vector<16x128xf32>
    %54 = tpu.matmul %53, %12, %cst_25 {dimension_numbers = #tpu.dot_dimension_numbers<[1], [0], [0], [1], [0, 0, 1, 1], [], []>} : vector<16x256xf32>, vector<256x128xf32>, vector<16x128xf32> -> vector<16x128xf32>
    %55 = vector.broadcast %13 : vector<1x128xf32> to vector<16x128xf32>
    %56 = arith.addf %54, %55 : vector<16x128xf32>
    %57 = math.tanh %56 : vector<16x128xf32>
    %58 = vector.extract_strided_slice %10 {offsets = [4, 0, 0], sizes = [1, 16, 128], strides = [1, 1, 1]} : vector<8x16x128xf32> to vector<1x16x128xf32>
    %59 = vector.shape_cast %58 : vector<1x16x128xf32> to vector<16x128xf32>
    %cst_26 = arith.constant dense<0.000000e+00> : vector<16x128xf32>
    %60 = tpu.matmul %52, %11, %cst_26 {dimension_numbers = #tpu.dot_dimension_numbers<[1], [0], [0], [1], [0, 0, 1, 1], [], []>} : vector<16x128xf32>, vector<128x128xf32>, vector<16x128xf32> -> vector<16x128xf32>
    %61 = arith.addf %59, %60 : vector<16x128xf32>
    %62 = math.tanh %61 : vector<16x128xf32>
    %63 = tpu.concatenate %62, %57 in 1 : vector<16x128xf32>, vector<16x128xf32> -> vector<16x256xf32>
    %cst_27 = arith.constant dense<0.000000e+00> : vector<16x128xf32>
    %64 = tpu.matmul %63, %12, %cst_27 {dimension_numbers = #tpu.dot_dimension_numbers<[1], [0], [0], [1], [0, 0, 1, 1], [], []>} : vector<16x256xf32>, vector<256x128xf32>, vector<16x128xf32> -> vector<16x128xf32>
    %65 = vector.broadcast %13 : vector<1x128xf32> to vector<16x128xf32>
    %66 = arith.addf %64, %65 : vector<16x128xf32>
    %67 = math.tanh %66 : vector<16x128xf32>
    %68 = vector.extract_strided_slice %10 {offsets = [5, 0, 0], sizes = [1, 16, 128], strides = [1, 1, 1]} : vector<8x16x128xf32> to vector<1x16x128xf32>
    %69 = vector.shape_cast %68 : vector<1x16x128xf32> to vector<16x128xf32>
    %cst_28 = arith.constant dense<0.000000e+00> : vector<16x128xf32>
    %70 = tpu.matmul %62, %11, %cst_28 {dimension_numbers = #tpu.dot_dimension_numbers<[1], [0], [0], [1], [0, 0, 1, 1], [], []>} : vector<16x128xf32>, vector<128x128xf32>, vector<16x128xf32> -> vector<16x128xf32>
    %71 = arith.addf %69, %70 : vector<16x128xf32>
    %72 = math.tanh %71 : vector<16x128xf32>
    %73 = tpu.concatenate %72, %67 in 1 : vector<16x128xf32>, vector<16x128xf32> -> vector<16x256xf32>
    %cst_29 = arith.constant dense<0.000000e+00> : vector<16x128xf32>
    %74 = tpu.matmul %73, %12, %cst_29 {dimension_numbers = #tpu.dot_dimension_numbers<[1], [0], [0], [1], [0, 0, 1, 1], [], []>} : vector<16x256xf32>, vector<256x128xf32>, vector<16x128xf32> -> vector<16x128xf32>
    %75 = vector.broadcast %13 : vector<1x128xf32> to vector<16x128xf32>
    %76 = arith.addf %74, %75 : vector<16x128xf32>
    %77 = math.tanh %76 : vector<16x128xf32>
    %78 = vector.extract_strided_slice %10 {offsets = [6, 0, 0], sizes = [1, 16, 128], strides = [1, 1, 1]} : vector<8x16x128xf32> to vector<1x16x128xf32>
    %79 = vector.shape_cast %78 : vector<1x16x128xf32> to vector<16x128xf32>
    %cst_30 = arith.constant dense<0.000000e+00> : vector<16x128xf32>
    %80 = tpu.matmul %72, %11, %cst_30 {dimension_numbers = #tpu.dot_dimension_numbers<[1], [0], [0], [1], [0, 0, 1, 1], [], []>} : vector<16x128xf32>, vector<128x128xf32>, vector<16x128xf32> -> vector<16x128xf32>
    %81 = arith.addf %79, %80 : vector<16x128xf32>
    %82 = math.tanh %81 : vector<16x128xf32>
    %83 = tpu.concatenate %82, %77 in 1 : vector<16x128xf32>, vector<16x128xf32> -> vector<16x256xf32>
    %cst_31 = arith.constant dense<0.000000e+00> : vector<16x128xf32>
    %84 = tpu.matmul %83, %12, %cst_31 {dimension_numbers = #tpu.dot_dimension_numbers<[1], [0], [0], [1], [0, 0, 1, 1], [], []>} : vector<16x256xf32>, vector<256x128xf32>, vector<16x128xf32> -> vector<16x128xf32>
    %85 = vector.broadcast %13 : vector<1x128xf32> to vector<16x128xf32>
    %86 = arith.addf %84, %85 : vector<16x128xf32>
    %87 = math.tanh %86 : vector<16x128xf32>
    %88 = vector.extract_strided_slice %10 {offsets = [7, 0, 0], sizes = [1, 16, 128], strides = [1, 1, 1]} : vector<8x16x128xf32> to vector<1x16x128xf32>
    %89 = vector.shape_cast %88 : vector<1x16x128xf32> to vector<16x128xf32>
    %cst_32 = arith.constant dense<0.000000e+00> : vector<16x128xf32>
    %90 = tpu.matmul %82, %11, %cst_32 {dimension_numbers = #tpu.dot_dimension_numbers<[1], [0], [0], [1], [0, 0, 1, 1], [], []>} : vector<16x128xf32>, vector<128x128xf32>, vector<16x128xf32> -> vector<16x128xf32>
    %91 = arith.addf %89, %90 : vector<16x128xf32>
    %92 = math.tanh %91 : vector<16x128xf32>
    %93 = tpu.concatenate %92, %87 in 1 : vector<16x128xf32>, vector<16x128xf32> -> vector<16x256xf32>
    %cst_33 = arith.constant dense<0.000000e+00> : vector<16x128xf32>
    %94 = tpu.matmul %93, %12, %cst_33 {dimension_numbers = #tpu.dot_dimension_numbers<[1], [0], [0], [1], [0, 0, 1, 1], [], []>} : vector<16x256xf32>, vector<256x128xf32>, vector<16x128xf32> -> vector<16x128xf32>
    %95 = vector.broadcast %13 : vector<1x128xf32> to vector<16x128xf32>
    %96 = arith.addf %94, %95 : vector<16x128xf32>
    %97 = math.tanh %96 : vector<16x128xf32>
    %c0_34 = arith.constant 0 : index
    %c0_35 = arith.constant 0 : index
    %c0_36 = arith.constant 0 : index
    %98 = vector.load %arg14[%c0_34, %c0_35, %c0_36] : memref<2x16x128xf32, #tpu.memory_space<vmem>>, vector<1x16x128xf32>
    %99 = vector.shape_cast %98 : vector<1x16x128xf32> to vector<16x128xf32>
    %100 = vector.shape_cast %92 : vector<16x128xf32> to vector<1x16x128xf32>
    tpu.vector_store %arg14[%c0_34, %c0_35, %c0_36], %100 {strides = array<i32>} : memref<2x16x128xf32, #tpu.memory_space<vmem>>, vector<1x16x128xf32>,
    %c1_37 = arith.constant 1 : index
    %c0_38 = arith.constant 0 : index
    %c0_39 = arith.constant 0 : index
    %101 = vector.load %arg14[%c1_37, %c0_38, %c0_39] : memref<2x16x128xf32, #tpu.memory_space<vmem>>, vector<1x16x128xf32>
    %102 = vector.shape_cast %101 : vector<1x16x128xf32> to vector<16x128xf32>
    %103 = vector.shape_cast %97 : vector<16x128xf32> to vector<1x16x128xf32>
    tpu.vector_store %arg14[%c1_37, %c0_38, %c0_39], %103 {strides = array<i32>} : memref<2x16x128xf32, #tpu.memory_space<vmem>>, vector<1x16x128xf32>,
    %c0_i32_40 = arith.constant 0 : i32
    %104 = arith.cmpi eq, %arg1, %c0_i32_40 : i32
    %105 = arith.extui %104 : i1 to i32
    %c0_i32_41 = arith.constant 0 : i32
    %106 = arith.cmpi ne, %105, %c0_i32_41 : i32
    scf.if %106 {
      %c0_42 = arith.constant 0 : index
      %c0_43 = arith.constant 0 : index
      %107 = vector.load %arg8[%c0_42, %c0_43] : memref<1x128xf32, #tpu.memory_space<vmem>>, vector<1x128xf32>
      %c0_44 = arith.constant 0 : index
      %c0_45 = arith.constant 0 : index
      %108 = vector.load %arg9[%c0_44, %c0_45] : memref<1x128xf32, #tpu.memory_space<vmem>>, vector<1x128xf32>
      %109 = tpu.iota {dimensions = array<i32: 1>} : vector<16x128xi32>
      %c32_i32 = arith.constant 32 : i32
      %110 = vector.broadcast %c32_i32 : i32 to vector<16x128xi32>
      %111 = arith.cmpi slt, %109, %110 : vector<16x128xi32>
      %cst_46 = arith.constant 0.000000e+00 : f32
      %112 = vector.broadcast %cst_46 : f32 to vector<16x128xf32>
      %113 = arith.select %111, %97, %112 : vector<16x128xi1>, vector<16x128xf32>
      %cst_47 = arith.constant dense<0.000000e+00> : vector<16xf32>
      %114 = vector.multi_reduction <add>, %113, %cst_47 [1] : vector<16x128xf32> to vector<16xf32>
      %115 = vector.shape_cast %114 : vector<16xf32> to vector<16x1xf32>
      %cst_48 = arith.constant 3.125000e-02 : f32
      %116 = vector.broadcast %cst_48 : f32 to vector<16x1xf32>
      %117 = arith.mulf %115, %116 : vector<16x1xf32>
      %118 = vector.broadcast %117 : vector<16x1xf32> to vector<16x128xf32>
      %119 = arith.subf %97, %118 : vector<16x128xf32>
      %cst_49 = arith.constant 0.000000e+00 : f32
      %120 = vector.broadcast %cst_49 : f32 to vector<16x128xf32>
      %121 = arith.select %111, %119, %120 : vector<16x128xi1>, vector<16x128xf32>
      %122 = arith.mulf %121, %121 : vector<16x128xf32>
      %cst_50 = arith.constant dense<0.000000e+00> : vector<16xf32>
      %123 = vector.multi_reduction <add>, %122, %cst_50 [1] : vector<16x128xf32> to vector<16xf32>
      %124 = vector.shape_cast %123 : vector<16xf32> to vector<16x1xf32>
      %cst_51 = arith.constant 3.125000e-02 : f32
      %125 = vector.broadcast %cst_51 : f32 to vector<16x1xf32>
      %126 = arith.mulf %124, %125 : vector<16x1xf32>
      %cst_52 = arith.constant 9.99999974E-6 : f32
      %127 = vector.broadcast %cst_52 : f32 to vector<16x1xf32>
      %128 = arith.addf %126, %127 : vector<16x1xf32>
      %129 = math.rsqrt %128 : vector<16x1xf32>
      %130 = vector.broadcast %129 : vector<16x1xf32> to vector<16x128xf32>
      %131 = arith.mulf %121, %130 : vector<16x128xf32>
      %132 = vector.broadcast %107 : vector<1x128xf32> to vector<16x128xf32>
      %133 = arith.mulf %131, %132 : vector<16x128xf32>
      %134 = vector.broadcast %108 : vector<1x128xf32> to vector<16x128xf32>
      %135 = arith.addf %133, %134 : vector<16x128xf32>
      %136 = arith.truncf %135 : vector<16x128xf32> to vector<16x128xbf16>
      %c0_53 = arith.constant 0 : index
      %c0_54 = arith.constant 0 : index
      %137 = vector.load %arg10[%c0_53, %c0_54] : memref<128x128xbf16, #tpu.memory_space<vmem>>, vector<128x128xbf16>
      %cst_55 = arith.constant dense<0.000000e+00> : vector<16x128xf32>
      %138 = tpu.matmul %136, %137, %cst_55 {dimension_numbers = #tpu.dot_dimension_numbers<[1], [0], [0], [1], [0, 0, 1, 1], [], []>} : vector<16x128xbf16>, vector<128x128xbf16>, vector<16x128xf32> -> vector<16x128xf32>
      %c0_56 = arith.constant 0 : index
      %c0_57 = arith.constant 0 : index
      %139 = vector.load %arg11[%c0_56, %c0_57] : memref<1x128xf32, #tpu.memory_space<vmem>>, vector<1x128xf32>
      %140 = vector.broadcast %139 : vector<1x128xf32> to vector<16x128xf32>
      %141 = arith.addf %138, %140 : vector<16x128xf32>
      %142 = tpu.iota {dimensions = array<i32: 1>} : vector<16x128xi32>
      %c64_i32 = arith.constant 64 : i32
      %143 = vector.broadcast %c64_i32 : i32 to vector<16x128xi32>
      %144 = arith.cmpi slt, %142, %143 : vector<16x128xi32>
      %cst_58 = arith.constant -1.000000e+30 : f32
      %145 = vector.broadcast %cst_58 : f32 to vector<16x128xf32>
      %146 = arith.select %144, %141, %145 : vector<16x128xi1>, vector<16x128xf32>
      %cst_59 = arith.constant dense<0xFF800000> : vector<16xf32>
      %147 = vector.multi_reduction <maximumf>, %146, %cst_59 [1] : vector<16x128xf32> to vector<16xf32>
      %148 = vector.shape_cast %147 : vector<16xf32> to vector<16x1xf32>
      %149 = vector.broadcast %148 : vector<16x1xf32> to vector<16x128xf32>
      %150 = arith.subf %146, %149 : vector<16x128xf32>
      %151 = math.exp %150 : vector<16x128xf32>
      %cst_60 = arith.constant 0.000000e+00 : f32
      %152 = vector.broadcast %cst_60 : f32 to vector<16x128xf32>
      %153 = arith.select %144, %151, %152 : vector<16x128xi1>, vector<16x128xf32>
      %cst_61 = arith.constant dense<0.000000e+00> : vector<16xf32>
      %154 = vector.multi_reduction <add>, %153, %cst_61 [1] : vector<16x128xf32> to vector<16xf32>
      %155 = vector.shape_cast %154 : vector<16xf32> to vector<16x1xf32>
      %156 = math.log %155 : vector<16x1xf32>
      %157 = vector.broadcast %156 : vector<16x1xf32> to vector<16x128xf32>
      %158 = arith.subf %150, %157 : vector<16x128xf32>
      %c0_62 = arith.constant 0 : index
      %c0_63 = arith.constant 0 : index
      %159 = vector.load %arg13[%c0_62, %c0_63] : memref<16x128xf32, #tpu.memory_space<vmem>>, vector<16x128xf32>
      tpu.vector_store %arg13[%c0_62, %c0_63], %158 {strides = array<i32>} : memref<16x128xf32, #tpu.memory_space<vmem>>, vector<16x128xf32>,
    } else {
    }
    return
  }
  func.func @transform_0(%arg0: i32, %arg1: i32) -> (i32, i32, i32) {
    %c0_i32 = arith.constant 0 : i32
    %c0_i32_0 = arith.constant 0 : i32
    return %arg1, %arg0, %c0_i32 : i32, i32, i32
  }
  func.func @transform_1(%arg0: i32, %arg1: i32) -> (i32, i32) {
    %c0_i32 = arith.constant 0 : i32
    %c0_i32_0 = arith.constant 0 : i32
    %c0_i32_1 = arith.constant 0 : i32
    return %c0_i32, %c0_i32_0 : i32, i32
  }
  func.func @transform_2(%arg0: i32, %arg1: i32) -> (i32, i32) {
    %c0_i32 = arith.constant 0 : i32
    %c0_i32_0 = arith.constant 0 : i32
    %c0_i32_1 = arith.constant 0 : i32
    return %c0_i32, %c0_i32_0 : i32, i32
  }
  func.func @transform_3(%arg0: i32, %arg1: i32) -> (i32, i32) {
    %c0_i32 = arith.constant 0 : i32
    %c0_i32_0 = arith.constant 0 : i32
    %c0_i32_1 = arith.constant 0 : i32
    return %c0_i32, %c0_i32_0 : i32, i32
  }
  func.func @transform_4(%arg0: i32, %arg1: i32) -> (i32, i32) {
    %c0_i32 = arith.constant 0 : i32
    %c0_i32_0 = arith.constant 0 : i32
    %c0_i32_1 = arith.constant 0 : i32
    return %c0_i32, %c0_i32_0 : i32, i32
  }
  func.func @transform_5(%arg0: i32, %arg1: i32) -> (i32, i32) {
    %c0_i32 = arith.constant 0 : i32
    %c0_i32_0 = arith.constant 0 : i32
    %c0_i32_1 = arith.constant 0 : i32
    return %c0_i32, %c0_i32_0 : i32, i32
  }
  func.func @transform_6(%arg0: i32, %arg1: i32) -> (i32, i32) {
    %c0_i32 = arith.constant 0 : i32
    %c0_i32_0 = arith.constant 0 : i32
    %c0_i32_1 = arith.constant 0 : i32
    return %c0_i32, %c0_i32_0 : i32, i32
  }
  func.func @transform_7(%arg0: i32, %arg1: i32) -> (i32, i32) {
    %c0_i32 = arith.constant 0 : i32
    %c0_i32_0 = arith.constant 0 : i32
    %c0_i32_1 = arith.constant 0 : i32
    return %c0_i32, %c0_i32_0 : i32, i32
  }
  func.func @transform_8(%arg0: i32, %arg1: i32) -> (i32, i32) {
    %c0_i32 = arith.constant 0 : i32
    %c0_i32_0 = arith.constant 0 : i32
    %c0_i32_1 = arith.constant 0 : i32
    return %c0_i32, %c0_i32_0 : i32, i32
  }
  func.func @transform_9(%arg0: i32, %arg1: i32) -> (i32, i32) {
    %c0_i32 = arith.constant 0 : i32
    %c0_i32_0 = arith.constant 0 : i32
    %c0_i32_1 = arith.constant 0 : i32
    return %c0_i32, %c0_i32_0 : i32, i32
  }
  func.func @transform_10(%arg0: i32, %arg1: i32) -> (i32, i32, i32) {
    %c0_i32 = arith.constant 0 : i32
    %c0_i32_0 = arith.constant 0 : i32
    %c0_i32_1 = arith.constant 0 : i32
    return %c0_i32, %arg0, %c0_i32_0 : i32, i32, i32
  }
  func.func @transform_11(%arg0: i32, %arg1: i32) -> (i32, i32) {
    %c0_i32 = arith.constant 0 : i32
    %c0_i32_0 = arith.constant 0 : i32
    return %arg0, %c0_i32 : i32, i32
  }
  func.func @transform_12(%arg0: i32, %arg1: i32) -> (i32, i32, i32) {
    %c0_i32 = arith.constant 0 : i32
    %c0_i32_0 = arith.constant 0 : i32
    %c0_i32_1 = arith.constant 0 : i32
    return %c0_i32, %arg0, %c0_i32_0 : i32, i32, i32
  }
}

</mosaic_0001>

<bundles_post_ra>
// kernel: rnnlm_forward.1
= control target key start
LH: loop header
LB: loop body
LE: loop exit
PB: predicated region body
PF: predicated region fallthrough
CT: control target
= control target key end

     0   :  { %vm2786_vm1 = vmmov 0   ;;  %s4049_s1 = inlined_call_operand.vmem [shape: bf16[128,128], index: 1, kind: input, shape index: {}]   ;;  %s4050_s3 = inlined_call_operand.vmem [shape: f32[128,128], index: 3, kind: input, shape index: {}]   ;;  %s4051_s0 = inlined_call_operand.vmem [shape: bf16[8,16,128], index: 0, kind: input, shape index: {}]   ;;  %s4052_s10 = inlined_call_operand.vmem [shape: f32[2,16,128], index: 10, kind: input, shape index: {}, may-alias: {10,12}]   ;;  %s4053_s4 = inlined_call_operand.vmem [shape: f32[256,128], index: 4, kind: input, shape index: {}]   ;;  %s4054_s2 = inlined_call_operand.vmem [shape: f32[1,128], index: 2, kind: input, shape index: {}]   ;;  %s4055_s5 = inlined_call_operand.vmem [shape: f32[1,128], index: 5, kind: input, shape index: {}]   ;;  %s4056_s12 = inlined_call_operand.vmem [shape: f32[2,16,128], index: 12, kind: output, shape index: {1}, may-alias: {10,12}]   ;;  %s4057_s8 = inlined_call_operand.vmem [shape: bf16[128,128], index: 8, kind: input, shape index: {}]   ;;  %s4058_s6 = inlined_call_operand.vmem [shape: f32[1,128], index: 6, kind: input, shape index: {}]   ;;  %s4059_s7 = inlined_call_operand.vmem [shape: f32[1,128], index: 7, kind: input, shape index: {}]   ;;  %s4060_s9 = inlined_call_operand.vmem [shape: f32[1,128], index: 9, kind: input, shape index: {}]   ;;  %s4061_s11 = inlined_call_operand.vmem [shape: f32[16,128], index: 11, kind: output, shape index: {0}]  }
   0x1   :  { %v2635_v0 = vld [vmem:[%s4049_s1 + $0x38] sm:$0xff]   ;;  %v2863_v2 = vld [vmem:[%s4050_s3 + $0x70] sm:$0xff]  ;;  %v2873_v4 = vld [vmem:[%s4050_s3 + $0x68] sm:$0xff] }
   0x2   :  { %v2858_v1 = vld [vmem:[%s4050_s3 + $0x78] sm:$0xff]  ;;  %2301 = vmatprep.subr.bf16.mxu0 %v2635_v0  ;;  %v2636_v3 = vld [vmem:[%s4049_s1 + $0x30] sm:$0xff]   ;;  %v2637_v5 = vld [vmem:[%s4049_s1 + $0x28] sm:$0xff]  }
   0x3   :  { %2333 = vmatprep.subr.mxu1 %v2858_v1  ;;  %2302 = vmatpush3.bf16.msra.mxu0 %v2635_v0  ;;  %v2883_v6 = vld [vmem:[%s4050_s3 + $0x60] sm:$0xff]  ;;  %v2890_v7 = vld [vmem:[%s4050_s3 + $0x58] sm:$0xff]  ;;  %v2900_v9 = vld [vmem:[%s4050_s3 + $0x50] sm:$0xff] }
   0x4   :  { %2334 = vmatpush3.msra.mxu1 %v2858_v1  ;;  %2303 = vmatprep.subr.bf16.mxu0 %v2636_v3  ;;  %v2638_v8 = vld [vmem:[%s4049_s1 + $0x20] sm:$0xff]   ;;  %v2907_v10 = vld [vmem:[%s4050_s3 + $0x48] sm:$0xff]  ;;  %v2639_v12 = vld [vmem:[%s4049_s1 + $0x18] sm:$0xff]  }
   0x5   :  { %2335 = vmatprep.subr.mxu1 %v2863_v2  ;;  %v2913_v11 = vld [vmem:[%s4050_s3 + $0x40] sm:$0xff]  ;;  %v2927_v14 = vld [vmem:[%s4050_s3 + $0x38] sm:$0xff]  ;;  %v2640_v16 = vld [vmem:[%s4049_s1 + $0x10] sm:$0xff]  }
   0x6   :  { %2336 = vmatpush3.msra.mxu1 %v2863_v2  ;;  %v2643_v13 = vld [vmem:[%s4051_s0] sm:$0xff]   ;;  %v2940_v17 = vld [vmem:[%s4050_s3 + $0x30] sm:$0xff]  ;;  %v2947_v18 = vld [vmem:[%s4050_s3 + $0x28] sm:$0xff] }
   0x7   :  { %2337 = vmatprep.subr.mxu1 %v2873_v4  ;;  %2304 = vmatpush3.bf16.msra.mxu0 %v2636_v3  ;;  %v45_v15 = vld [vmem:[%s4052_s10] sm:$0xff]  ;;  %v2641_v19 = vld [vmem:[%s4049_s1 + $0x8] sm:$0xff]   ;;  %v2963_v21 = vld [vmem:[%s4050_s3 + $0x18] sm:$0xff] }
   0x8   :  { %2338 = vmatpush3.msra.mxu1 %v2873_v4  ;;  %2305 = vmatprep.subr.bf16.mxu0 %v2637_v5  ;;  %v2957_v20 = vld [vmem:[%s4050_s3 + $0x20] sm:$0xff]  ;;  %v2974_v23 = vld [vmem:[%s4050_s3 + $0x10] sm:$0xff]  ;;  %v2981_v24 = vld [vmem:[%s4050_s3 + $0x8] sm:$0xff] }
   0x9   :  { %2339 = vmatprep.subr.mxu1 %v2883_v6  ;;  %2317 = vmatprep.mubr.bf16.mxu0 %v2643_v13  ;;  %v2642_v22 = vld [vmem:[%s4049_s1] sm:$0xff]   ;;  %v2993_v26 = vld [vmem:[%s4053_s4 + $0xf8] sm:$0xff]  ;;  %v2644_v27 = vld [vmem:[%s4051_s0 + $0x8] sm:$0xff]  }
   0xa   :  { %2340 = vmatpush3.msra.mxu1 %v2883_v6  ;;  %2365 = vmatprep.mubr.f32.mxu1 %v45_v15  ;;  %v2988_v25 = vld [vmem:[%s4050_s3] sm:$0xff]  ;;  %4070 = vst [vmem:[#allocation3_spill] sm:$0xff] %v2993_v26  ;;  %v46_v28 = vld [vmem:[%s4052_s10 + $0x8] sm:$0xff]  ;;  %v2645_v29 = vld [vmem:[%s4051_s0 + $0x10] sm:$0xff]  }
   0xb   :  { %2341 = vmatprep.subr.mxu1 %v2890_v7  ;;  %2306 = vmatpush3.bf16.msra.mxu0 %v2637_v5  ;;  %v3011_v30 = vld [vmem:[%s4053_s4 + $0x78] sm:$0xff]  ;;  %v3017_v31 = vld [vmem:[%s4053_s4 + $0xf0] sm:$0xff]  ;;  %v3028_v33 = vld [vmem:[%s4053_s4 + $0xe8] sm:$0xff] }
   0xc   :  { %2342 = vmatpush3.msra.mxu1 %v2890_v7  ;;  %2307 = vmatprep.subr.bf16.mxu0 %v2638_v8  ;;  %v3022_v32 = vld [vmem:[%s4053_s4 + $0x70] sm:$0xff]  ;;  %v3035_v34 = vld [vmem:[%s4053_s4 + $0x68] sm:$0xff]  ;;  %v3042_v35 = vld [vmem:[%s4053_s4 + $0xe0] sm:$0xff] }
   0xd   :  { %2343 = vmatprep.subr.mxu1 %v2900_v9  ;;  %v2646_v36 = vld [vmem:[%s4051_s0 + $0x18] sm:$0xff]   ;;  %v3052_v37 = vld [vmem:[%s4053_s4 + $0x60] sm:$0xff]  ;;  %v3076_v41 = vld [vmem:[%s4053_s4 + $0xd0] sm:$0xff] }
   0xe   :  { %2344 = vmatpush3.msra.mxu1 %v2900_v9  ;;  %v3059_v38 = vld [vmem:[%s4053_s4 + $0xd8] sm:$0xff]  ;;  %v2647_v39 = vld [vmem:[%s4051_s0 + $0x20] sm:$0xff]   ;;  %v2648_v42 = vld [vmem:[%s4051_s0 + $0x28] sm:$0xff]  }
   0xf   :  { %2345 = vmatprep.subr.mxu1 %v2907_v10  ;;  %2308 = vmatpush3.bf16.msra.mxu0 %v2638_v8  ;;  %v3069_v40 = vld [vmem:[%s4053_s4 + $0x58] sm:$0xff]  ;;  %v3114_v43 = vld [vmem:[%s4053_s4 + $0x50] sm:$0xff]  ;;  %v3119_v44 = vld [vmem:[%s4053_s4 + $0xc8] sm:$0xff] }
  0x10   :  { %2346 = vmatpush3.msra.mxu1 %v2907_v10  ;;  %2309 = vmatprep.subr.bf16.mxu0 %v2639_v12  ;;  %v3125_v45 = vld [vmem:[%s4053_s4 + $0x48] sm:$0xff]  ;;  %v3131_v46 = vld [vmem:[%s4053_s4 + $0xc0] sm:$0xff]  ;;  %v3143_v48 = vld [vmem:[%s4053_s4 + $0xb8] sm:$0xff] }
  0x11   :  { %2347 = vmatprep.subr.mxu1 %v2913_v11  ;;  %v3137_v47 = vld [vmem:[%s4053_s4 + $0x40] sm:$0xff]  ;;  %v3149_v49 = vld [vmem:[%s4053_s4 + $0x38] sm:$0xff]  ;;  %v2649_v50 = vld [vmem:[%s4051_s0 + $0x30] sm:$0xff]  }
  0x12   :  { %2348 = vmatpush3.msra.mxu1 %v2913_v11  ;;  %v3158_v51 = vld [vmem:[%s4053_s4 + $0xb0] sm:$0xff]  ;;  %v2650_v52 = vld [vmem:[%s4051_s0 + $0x38] sm:$0xff]   ;;  %v3173_v54 = vld [vmem:[%s4053_s4 + $0xa8] sm:$0xff] }
  0x13   :  { %2349 = vmatprep.subr.mxu1 %v2927_v14  ;;  %2310 = vmatpush3.bf16.msra.mxu0 %v2639_v12  ;;  %v3167_v53 = vld [vmem:[%s4053_s4 + $0x30] sm:$0xff]  ;;  %v3179_v55 = vld [vmem:[%s4053_s4 + $0x28] sm:$0xff]  ;;  %v3185_v56 = vld [vmem:[%s4053_s4 + $0xa0] sm:$0xff] }
  0x14   :  { %2350 = vmatpush3.msra.mxu1 %v2927_v14  ;;  %2311 = vmatprep.subr.bf16.mxu0 %v2640_v16  ;;  %v3191_v57 = vld [vmem:[%s4053_s4 + $0x20] sm:$0xff]  ;;  %v3196_v58 = vld [vmem:[%s4053_s4 + $0x98] sm:$0xff]  ;;  %v3208_v60 = vld [vmem:[%s4053_s4 + $0x90] sm:$0xff] }
  0x15   :  { %2351 = vmatprep.subr.mxu1 %v2940_v17  ;;  %v3202_v59 = vld [vmem:[%s4053_s4 + $0x18] sm:$0xff]  ;;  %v3214_v61 = vld [vmem:[%s4053_s4 + $0x10] sm:$0xff]  ;;  %v3223_v63 = vld [vmem:[%s4053_s4 + $0x88] sm:$0xff] }
  0x16   :  { %2352 = vmatpush3.msra.mxu1 %v2940_v17  ;;  %v47_v62 = vld [vmem:[%s4052_s10 + $0x10] sm:$0xff]  ;;  %v3229_v0 = vld [vmem:[%s4053_s4 + $0x8] sm:$0xff]  ;;  %v3235_v3 = vld [vmem:[%s4053_s4 + $0x80] sm:$0xff] }
  0x17   :  { %2353 = vmatprep.subr.mxu1 %v2947_v18  ;;  %2312 = vmatpush3.bf16.msra.mxu0 %v2640_v16  ;;  %4071 = vst [vmem:[#allocation4_spill] sm:$0xff] %v3229_v0  ;;  %4072 = vst [vmem:[#allocation5_spill] sm:$0xff] %v3235_v3  ;;  %v3241_v5 = vld [vmem:[%s4053_s4] sm:$0xff] }
  0x18   :  { %2354 = vmatpush3.msra.mxu1 %v2947_v18  ;;  %2313 = vmatprep.subr.bf16.mxu0 %v2641_v19  ;;  %4073 = vst [vmem:[#allocation6_spill] sm:$0xff] %v3241_v5  ;;  %v3252_v13 = vld [vmem:[%s4054_s2] ss:$0 sm:$0xff] }
  0x19   :  { %2355 = vmatprep.subr.mxu1 %v2957_v20 }
  0x1a   :  { %2356 = vmatpush3.msra.mxu1 %v2957_v20 }
  0x1b   :  { %2357 = vmatprep.subr.mxu1 %v2963_v21  ;;  %2314 = vmatpush3.bf16.msra.mxu0 %v2641_v19 }
  0x1c   :  { %2358 = vmatpush3.msra.mxu1 %v2963_v21  ;;  %2315 = vmatprep.subr.bf16.mxu0 %v2642_v22 }
  0x1d   :  { %2359 = vmatprep.subr.mxu1 %v2974_v23 }
  0x1e   :  { %2360 = vmatpush3.msra.mxu1 %v2974_v23 }
  0x1f   :  { %2361 = vmatprep.subr.mxu1 %v2981_v24  ;;  %2316 = vmatpush3.bf16.msra.mxu0 %v2642_v22 }
  0x20   :  { %2362 = vmatpush3.msra.mxu1 %v2981_v24  ;;  %1862 = vmatprep.subr.mxu0 %v2993_v26 }
  0x21   :  { %2363 = vmatprep.subr.mxu1 %v2988_v25 }
  0x22   :  { %2364 = vmatpush3.msra.mxu1 %v2988_v25  ;;  %2318 = vmatmul.mubr.bf16.vlgmr.msra.gmra.mxu0 %v2644_v27 }
  0x23   :  { %2366 = vmatmul.mubr.f32.vlgmr.msra.gmra.mxu1 %v46_v28  ;;  %1863 = vmatpush3.msra.mxu0 %v3011_v30 }
  0x24   :  { %2321 = vmatprep.mubr.bf16.mxu0 %v2645_v29  ;;  %1864 = vmatprep.subr.mxu0 %v3017_v31 }
  0x25   :  { %2368 = vmatprep.subr.mxu1 %v2858_v1  ;;  %1865 = vmatpush3.msra.mxu0 %v3022_v32 }
  0x26   :  { %2369 = vmatpush3.msra.mxu1 %v2858_v1  ;;  %1866 = vmatprep.subr.mxu0 %v3028_v33 }
  0x27   :  { %2370 = vmatprep.subr.mxu1 %v2863_v2  ;;  %1867 = vmatpush3.msra.mxu0 %v3035_v34 }
  0x28   :  { %2371 = vmatpush3.msra.mxu1 %v2863_v2  ;;  %1868 = vmatprep.subr.mxu0 %v3042_v35 }
  0x29   :  { %2372 = vmatprep.subr.mxu1 %v2873_v4  ;;  %1869 = vmatpush3.msra.mxu0 %v3052_v37 }
  0x2a   :  { %2373 = vmatpush3.msra.mxu1 %v2873_v4  ;;  %2322 = vmatmul.mubr.bf16.gmra.mxu0 %v2646_v36 }
  0x2b   :  { %1870 = vmatprep.subr.mxu0 %v3059_v38  ;;  %2325 = vmatprep.mubr.bf16.mxu0 %v2647_v39  ;;  %v48_v39 = vld [vmem:[%s4052_s10 + $0x18] sm:$0xff] }
  0x2c   :  { %1871 = vmatpush3.msra.mxu0 %v3069_v40  ;;  %2374 = vmatprep.subr.mxu1 %v2883_v6 }
  0x2d   :  { %1872 = vmatprep.subr.mxu0 %v3076_v41  ;;  %2375 = vmatpush3.msra.mxu1 %v2883_v6 }
  0x2e   :  { %2376 = vmatprep.subr.mxu1 %v2890_v7  ;;  %1873 = vmatpush3.msra.mxu0 %v3114_v43 }
  0x2f   :  { %2377 = vmatpush3.msra.mxu1 %v2890_v7  ;;  %1874 = vmatprep.subr.mxu0 %v3119_v44 }
  0x30   :  { %2378 = vmatprep.subr.mxu1 %v2900_v9  ;;  %1875 = vmatpush3.msra.mxu0 %v3125_v45 }
  0x31   :  { %2379 = vmatpush3.msra.mxu1 %v2900_v9  ;;  %1876 = vmatprep.subr.mxu0 %v3131_v46 }
  0x32   :  { %2380 = vmatprep.subr.mxu1 %v2907_v10  ;;  %2326 = vmatmul.mubr.bf16.gmra.mxu0 %v2648_v42 }
  0x33   :  { %2381 = vmatpush3.msra.mxu1 %v2907_v10  ;;  %1877 = vmatpush3.msra.mxu0 %v3137_v47 }
  0x34   :  { %2382 = vmatprep.subr.mxu1 %v2913_v11  ;;  %1878 = vmatprep.subr.mxu0 %v3143_v48 }
  0x35   :  { %2383 = vmatpush3.msra.mxu1 %v2913_v11  ;;  %1879 = vmatpush3.msra.mxu0 %v3149_v49 }
  0x36   :  { %2384 = vmatprep.subr.mxu1 %v2927_v14  ;;  %2329 = vmatprep.mubr.bf16.mxu0 %v2649_v50 }
  0x37   :  { %2385 = vmatpush3.msra.mxu1 %v2927_v14  ;;  %1880 = vmatprep.subr.mxu0 %v3158_v51 }
  0x38   :  { %2386 = vmatprep.subr.mxu1 %v2940_v17  ;;  %1881 = vmatpush3.msra.mxu0 %v3167_v53 }
  0x39   :  { %2387 = vmatpush3.msra.mxu1 %v2940_v17  ;;  %1882 = vmatprep.subr.mxu0 %v3173_v54 }
  0x3a   :  { %2388 = vmatprep.subr.mxu1 %v2947_v18  ;;  %2330 = vmatmul.mubr.bf16.gmra.mxu0 %v2650_v52 }
  0x3b   :  { %2389 = vmatpush3.msra.mxu1 %v2947_v18  ;;  %1883 = vmatpush3.msra.mxu0 %v3179_v55 }
  0x3c   :  { %2390 = vmatprep.subr.mxu1 %v2957_v20  ;;  %1884 = vmatprep.subr.mxu0 %v3185_v56 }
  0x3d   :  { %2391 = vmatpush3.msra.mxu1 %v2957_v20  ;;  %1885 = vmatpush3.msra.mxu0 %v3191_v57 }
  0x3e   :  { %2392 = vmatprep.subr.mxu1 %v2963_v21  ;;  %1886 = vmatprep.subr.mxu0 %v3196_v58 }
  0x3f   :  { %2393 = vmatpush3.msra.mxu1 %v2963_v21  ;;  %1887 = vmatpush3.msra.mxu0 %v3202_v59 }
  0x40   :  { %2394 = vmatprep.subr.mxu1 %v2974_v23  ;;  %488 = vmatprep.mubr.f32.mxu0 %v47_v62 }
  0x41   :  { %2395 = vmatpush3.msra.mxu1 %v2974_v23  ;;  %1888 = vmatprep.subr.mxu0 %v3208_v60 }
  0x42   :  { %2396 = vmatprep.subr.mxu1 %v2981_v24  ;;  %1889 = vmatpush3.msra.mxu0 %v3214_v61 }
  0x43   :  { %2397 = vmatpush3.msra.mxu1 %v2981_v24  ;;  %1890 = vmatprep.subr.mxu0 %v3223_v63 }
  0x44   :  { %2398 = vmatprep.subr.mxu1 %v2988_v25  ;;  %1891 = vmatpush3.msra.mxu0 %v3229_v0 }
  0x45   :  { %2399 = vmatpush3.msra.mxu1 %v2988_v25  ;;  %1892 = vmatprep.subr.mxu0 %v3235_v3 }
  0x46   :  { %2403 = vmatprep.subr.mxu1 %v2858_v1  ;;  %1893 = vmatpush3.msra.mxu0 %v3241_v5 }
  0x47   :  { %1918 = vmatprep.subr.mxu0 %v2993_v26 }
  0xe2   :  { %v3247_v8 = vpop.f32.mrf.mxu0 }
  0xe3   :  { %v2367_v12 = vpop.f32.mrf.mxu1 }
  0xe4   :  { %v222_v15 = vpop.f32.mrf.mxu0 }
  0xe5   :  { %v405_v16 = vpop.f32.mrf.mxu1  ;;  %v223_v19 = vadd.f32 %v3252_v13, %v222_v15 }
  0xe6   :  { %v3255_v22 = vpop.f32.mrf.mxu0 }
  0xe7   :  { %v414_v27 = vadd.f32 %v405_v16, %v223_v19 }
  0xe8   :  { %v225_v28 = vpop.f32.mrf.mxu0 }
  0xe9   :  { %2659 = vtanh.f32 %v414_v27  ;;  %v226_v29 = vadd.f32 %v3252_v13, %v225_v28 }
  0xea   :  { %v3325_v52 = vpop.f32.mrf.mxu0 }
  0xeb   :  { %v415_v36 = vadd.f32 %v2367_v12, %v226_v29  ;;  %4074 = vst [vmem:[#allocation7_spill] sm:$0xff] %v3325_v52  ;;  %v3352_v52 = vld [vmem:[%s4055_s5] ss:$0 sm:$0xff] }
  0xec   :  { %v3327_v62 = vpop.f32.mrf.mxu0 }
  0xed   :  { %2661 = vtanh.f32 %v415_v36  ;;  %4075 = vst [vmem:[#allocation8_spill] sm:$0xff] %v3327_v62 }
  0xee   :  { %v3329_v12 = vpop.f32.mrf.mxu0 }
  0xef   :  { %4076 = vst [vmem:[#allocation9_spill] sm:$0xff] %v3329_v12 }
  0xf0   :  { %v3331_v15 = vpop.f32.mrf.mxu0 }
  0xf1   :  { %4077 = vst [vmem:[#allocation10_spill] sm:$0xff] %v3331_v15 }
  0xf2   :  { %v3333_v16 = vpop.f32.mrf.mxu0 }
  0xf3   :  { %4078 = vst [vmem:[#allocation11_spill] sm:$0xff] %v3333_v16 }
  0xf4   :  { %v3335_v19 = vpop.f32.mrf.mxu0 }
  0xf5   :  { %4079 = vst [vmem:[#allocation12_spill] sm:$0xff] %v3335_v19 }
  0xf6   :  { %v2660_v42 = vpop.eup %2659  ;;  %v3337_v27 = vpop.f32.mrf.mxu0 }
  0xf7   :  { %489 = vmatmul.mubr.f32.vlgmr.msra.gmra.mxu0 %v2660_v42  ;;  %2400 = vmatprep.mubr.f32.mxu1 %v2660_v42  ;;  %4080 = vst [vmem:[#allocation13_spill] sm:$0xff] %v3337_v27  ;;  %v234_v27 = vadd.f32 %v3255_v22, %v3252_v13 }
  0xf8   :  { %493 = vmatprep.mubr.f32.mxu0 %v48_v39  ;;  %1919 = vmatpush3.msra.mxu0 %v3011_v30  ;;  %v3339_v28 = vpop.f32.mrf.mxu0 }
  0xf9   :  { %1920 = vmatprep.subr.mxu0 %v3017_v31  ;;  %4081 = vst [vmem:[#allocation14_spill] sm:$0xff] %v3339_v28 }
  0xfa   :  { %v2662_v50 = vpop.eup %2661  ;;  %1921 = vmatpush3.msra.mxu0 %v3022_v32  ;;  %v3341_v29 = vpop.f32.mrf.mxu0 }
  0xfb   :  { %494 = vmatmul.mubr.f32.gmra.mxu0 %v2662_v50  ;;  %2401 = vmatmul.mubr.f32.vlgmr.msra.gmra.mxu1 %v2662_v50  ;;  %4082 = vst [vmem:[#allocation15_spill] sm:$0xff] %v3341_v29  ;;  %v231_v29 = vadd.f32 %v3247_v8, %v3252_v13 }
  0xfc   :  { %2404 = vmatpush3.msra.mxu1 %v2858_v1  ;;  %1922 = vmatprep.subr.mxu0 %v3028_v33  ;;  %v3343_v36 = vpop.f32.mrf.mxu0 }
  0xfd   :  { %2405 = vmatprep.subr.mxu1 %v2863_v2  ;;  %1923 = vmatpush3.msra.mxu0 %v3035_v34  ;;  %4083 = vst [vmem:[#allocation16_spill] sm:$0xff] %v3343_v36 }
  0xfe   :  { %2406 = vmatpush3.msra.mxu1 %v2863_v2  ;;  %1924 = vmatprep.subr.mxu0 %v3042_v35  ;;  %v3345_v39 = vpop.f32.mrf.mxu0 }
  0xff   :  { %2407 = vmatprep.subr.mxu1 %v2873_v4  ;;  %1925 = vmatpush3.msra.mxu0 %v3052_v37  ;;  %4084 = vst [vmem:[#allocation17_spill] sm:$0xff] %v3345_v39 }
 0x100   :  { %2408 = vmatpush3.msra.mxu1 %v2873_v4  ;;  %1926 = vmatprep.subr.mxu0 %v3059_v38  ;;  %v3347_v42 = vpop.f32.mrf.mxu0 }
 0x101   :  { %2409 = vmatprep.subr.mxu1 %v2883_v6  ;;  %1927 = vmatpush3.msra.mxu0 %v3069_v40  ;;  %4085 = vst [vmem:[#allocation18_spill] sm:$0xff] %v3347_v42 }
 0x102   :  { %2410 = vmatpush3.msra.mxu1 %v2883_v6  ;;  %1928 = vmatprep.subr.mxu0 %v3076_v41 }
 0x103   :  { %2411 = vmatprep.subr.mxu1 %v2890_v7  ;;  %1929 = vmatpush3.msra.mxu0 %v3114_v43 }
 0x104   :  { %2412 = vmatpush3.msra.mxu1 %v2890_v7  ;;  %1930 = vmatprep.subr.mxu0 %v3119_v44 }
 0x105   :  { %2413 = vmatprep.subr.mxu1 %v2900_v9  ;;  %1931 = vmatpush3.msra.mxu0 %v3125_v45 }
 0x106   :  { %2414 = vmatpush3.msra.mxu1 %v2900_v9  ;;  %1932 = vmatprep.subr.mxu0 %v3131_v46 }
 0x107   :  { %2415 = vmatprep.subr.mxu1 %v2907_v10  ;;  %1933 = vmatpush3.msra.mxu0 %v3137_v47 }
 0x108   :  { %2416 = vmatpush3.msra.mxu1 %v2907_v10  ;;  %1934 = vmatprep.subr.mxu0 %v3143_v48 }
 0x109   :  { %2417 = vmatprep.subr.mxu1 %v2913_v11  ;;  %1935 = vmatpush3.msra.mxu0 %v3149_v49 }
 0x10a   :  { %2418 = vmatpush3.msra.mxu1 %v2913_v11  ;;  %1936 = vmatprep.subr.mxu0 %v3158_v51 }
 0x10b   :  { %2419 = vmatprep.subr.mxu1 %v2927_v14  ;;  %1937 = vmatpush3.msra.mxu0 %v3167_v53 }
 0x10c   :  { %2420 = vmatpush3.msra.mxu1 %v2927_v14  ;;  %1938 = vmatprep.subr.mxu0 %v3173_v54 }
 0x10d   :  { %2421 = vmatprep.subr.mxu1 %v2940_v17  ;;  %1939 = vmatpush3.msra.mxu0 %v3179_v55 }
 0x10e   :  { %2422 = vmatpush3.msra.mxu1 %v2940_v17  ;;  %1940 = vmatprep.subr.mxu0 %v3185_v56 }
 0x10f   :  { %2423 = vmatprep.subr.mxu1 %v2947_v18  ;;  %1941 = vmatpush3.msra.mxu0 %v3191_v57 }
 0x110   :  { %2424 = vmatpush3.msra.mxu1 %v2947_v18  ;;  %1942 = vmatprep.subr.mxu0 %v3196_v58 }
 0x111   :  { %2425 = vmatprep.subr.mxu1 %v2957_v20  ;;  %1943 = vmatpush3.msra.mxu0 %v3202_v59 }
 0x112   :  { %2426 = vmatpush3.msra.mxu1 %v2957_v20  ;;  %1944 = vmatprep.subr.mxu0 %v3208_v60 }
 0x113   :  { %2427 = vmatprep.subr.mxu1 %v2963_v21  ;;  %1945 = vmatpush3.msra.mxu0 %v3214_v61 }
 0x114   :  { %2428 = vmatpush3.msra.mxu1 %v2963_v21  ;;  %1946 = vmatprep.subr.mxu0 %v3223_v63 }
 0x115   :  { %2429 = vmatprep.subr.mxu1 %v2974_v23  ;;  %1947 = vmatpush3.msra.mxu0 %v3229_v0 }
 0x116   :  { %2430 = vmatpush3.msra.mxu1 %v2974_v23  ;;  %1948 = vmatprep.subr.mxu0 %v3235_v3 }
 0x117   :  { %2431 = vmatprep.subr.mxu1 %v2981_v24  ;;  %1949 = vmatpush3.msra.mxu0 %v3241_v5 }
 0x118   :  { %2432 = vmatpush3.msra.mxu1 %v2981_v24  ;;  %1974 = vmatprep.subr.mxu0 %v2993_v26 }
 0x119   :  { %2433 = vmatprep.subr.mxu1 %v2988_v25 }
 0x11a   :  { %2434 = vmatpush3.msra.mxu1 %v2988_v25 }
 0x11b   :  { %2438 = vmatprep.subr.mxu1 %v2858_v1 }
 0x1b7   :  { %v1894_v50 = vpop.f32.mrf.mxu0 }
 0x1b9   :  { %v1895_v16 = vpop.f32.mrf.mxu0 }
 0x1ba   :  { %v1896_v19 = vadd.f32 %v1895_v16, %v1894_v50 }
 0x1bb   :  { %v1897_v28 = vpop.f32.mrf.mxu0  ;;  %v2402_v12 = vpop.f32.mrf.mxu1 }
 0x1bc   :  { %v491_v39 = vadd.f32 %v1896_v19, %v3352_v52  ;;  %v577_v36 = vadd.f32 %v2402_v12, %v234_v27  ;;  %v4089_v27 = vld [vmem:[#allocation8_spill] sm:$0xff] }
 0x1bd   :  { %v1898_v42 = vpop.f32.mrf.mxu0  ;;  %v567_v62 = vpop.f32.mrf.mxu1 }
 0x1be   :  { %2663 = vtanh.f32 %v491_v39  ;;  %v1899_v15 = vadd.f32 %v1898_v42, %v1897_v28  ;;  %v576_v26 = vadd.f32 %v567_v62, %v231_v29  ;;  %v4088_v62 = vld [vmem:[#allocation10_spill] sm:$0xff]  ;;  %v239_v28 = vadd.f32 %v3252_v13, %v4089_v27 }
 0x1bf   :  { %v242_v12 = vadd.f32 %v3252_v13, %v4088_v62 }
 0x1c0   :  { %v496_v5 = vadd.f32 %v1899_v15, %v3352_v52  ;;  %2665 = vtanh.f32 %v576_v26  ;;  %v4086_v26 = vld [vmem:[#allocation6_spill] sm:$0xff] }
 0x1c1   :  { %2667 = vtanh.f32 %v577_v36 }
 0x1c2   :  { %2669 = vtanh.f32 %v496_v5  ;;  %v4087_v5 = vld [vmem:[#allocation3_spill] sm:$0xff] }
 0x1cb   :  { %v2664_v16 = vpop.eup %2663 }
 0x1cc   :  { %644 = vmatprep.mubr.f32.mxu0 %v2664_v16 }
 0x1cd   :  { %v2666_v22 = vpop.eup %2665 }
 0x1ce   :  { %v2668_v50 = vpop.eup %2667  ;;  %645 = vmatmul.mubr.f32.vlgmr.msra.gmra.mxu0 %v2666_v22  ;;  %2435 = vmatprep.mubr.f32.mxu1 %v2666_v22 }
 0x1cf   :  { %v2670_v8 = vpop.eup %2669  ;;  %2436 = vmatmul.mubr.f32.vlgmr.msra.gmra.mxu1 %v2668_v50  ;;  %1975 = vmatpush3.msra.mxu0 %v3011_v30 }
 0x1d0   :  { %649 = vmatprep.mubr.f32.mxu0 %v2670_v8  ;;  %2439 = vmatpush3.msra.mxu1 %v2858_v1 }
 0x1d1   :  { %2440 = vmatprep.subr.mxu1 %v2863_v2  ;;  %1976 = vmatprep.subr.mxu0 %v3017_v31 }
 0x1d2   :  { %650 = vmatmul.mubr.f32.gmra.mxu0 %v2668_v50  ;;  %2441 = vmatpush3.msra.mxu1 %v2863_v2 }
 0x1d3   :  { %1977 = vmatpush3.msra.mxu0 %v3022_v32  ;;  %2442 = vmatprep.subr.mxu1 %v2873_v4 }
 0x1d4   :  { %1978 = vmatprep.subr.mxu0 %v3028_v33  ;;  %2443 = vmatpush3.msra.mxu1 %v2873_v4 }
 0x1d5   :  { %1979 = vmatpush3.msra.mxu0 %v3035_v34  ;;  %2444 = vmatprep.subr.mxu1 %v2883_v6 }
 0x1d6   :  { %1980 = vmatprep.subr.mxu0 %v3042_v35  ;;  %2445 = vmatpush3.msra.mxu1 %v2883_v6 }
 0x1d7   :  { %1981 = vmatpush3.msra.mxu0 %v3052_v37  ;;  %2446 = vmatprep.subr.mxu1 %v2890_v7 }
 0x1d8   :  { %1982 = vmatprep.subr.mxu0 %v3059_v38  ;;  %2447 = vmatpush3.msra.mxu1 %v2890_v7 }
 0x1d9   :  { %1983 = vmatpush3.msra.mxu0 %v3069_v40  ;;  %2448 = vmatprep.subr.mxu1 %v2900_v9 }
 0x1da   :  { %1984 = vmatprep.subr.mxu0 %v3076_v41  ;;  %2449 = vmatpush3.msra.mxu1 %v2900_v9 }
 0x1db   :  { %1985 = vmatpush3.msra.mxu0 %v3114_v43  ;;  %2450 = vmatprep.subr.mxu1 %v2907_v10 }
 0x1dc   :  { %1986 = vmatprep.subr.mxu0 %v3119_v44  ;;  %2451 = vmatpush3.msra.mxu1 %v2907_v10 }
 0x1dd   :  { %1987 = vmatpush3.msra.mxu0 %v3125_v45  ;;  %2452 = vmatprep.subr.mxu1 %v2913_v11 }
 0x1de   :  { %1988 = vmatprep.subr.mxu0 %v3131_v46  ;;  %2453 = vmatpush3.msra.mxu1 %v2913_v11 }
 0x1df   :  { %1989 = vmatpush3.msra.mxu0 %v3137_v47  ;;  %2454 = vmatprep.subr.mxu1 %v2927_v14 }
 0x1e0   :  { %1990 = vmatprep.subr.mxu0 %v3143_v48  ;;  %2455 = vmatpush3.msra.mxu1 %v2927_v14 }
 0x1e1   :  { %1991 = vmatpush3.msra.mxu0 %v3149_v49  ;;  %2456 = vmatprep.subr.mxu1 %v2940_v17 }
 0x1e2   :  { %1992 = vmatprep.subr.mxu0 %v3158_v51  ;;  %2457 = vmatpush3.msra.mxu1 %v2940_v17 }
 0x1e3   :  { %1993 = vmatpush3.msra.mxu0 %v3167_v53  ;;  %2458 = vmatprep.subr.mxu1 %v2947_v18 }
 0x1e4   :  { %1994 = vmatprep.subr.mxu0 %v3173_v54  ;;  %2459 = vmatpush3.msra.mxu1 %v2947_v18 }
 0x1e5   :  { %1995 = vmatpush3.msra.mxu0 %v3179_v55  ;;  %2460 = vmatprep.subr.mxu1 %v2957_v20 }
 0x1e6   :  { %1996 = vmatprep.subr.mxu0 %v3185_v56  ;;  %2461 = vmatpush3.msra.mxu1 %v2957_v20 }
 0x1e7   :  { %1997 = vmatpush3.msra.mxu0 %v3191_v57  ;;  %2462 = vmatprep.subr.mxu1 %v2963_v21 }
 0x1e8   :  { %1998 = vmatprep.subr.mxu0 %v3196_v58  ;;  %2463 = vmatpush3.msra.mxu1 %v2963_v21 }
 0x1e9   :  { %1999 = vmatpush3.msra.mxu0 %v3202_v59  ;;  %2464 = vmatprep.subr.mxu1 %v2974_v23 }
 0x1ea   :  { %2000 = vmatprep.subr.mxu0 %v3208_v60  ;;  %2465 = vmatpush3.msra.mxu1 %v2974_v23 }
 0x1eb   :  { %2001 = vmatpush3.msra.mxu0 %v3214_v61  ;;  %2466 = vmatprep.subr.mxu1 %v2981_v24 }
 0x1ec   :  { %2002 = vmatprep.subr.mxu0 %v3223_v63  ;;  %2467 = vmatpush3.msra.mxu1 %v2981_v24 }
 0x1ed   :  { %2003 = vmatpush3.msra.mxu0 %v3229_v0  ;;  %2468 = vmatprep.subr.mxu1 %v2988_v25 }
 0x1ee   :  { %2004 = vmatprep.subr.mxu0 %v3235_v3  ;;  %2469 = vmatpush3.msra.mxu1 %v2988_v25 }
 0x1ef   :  { %2005 = vmatpush3.msra.mxu0 %v4086_v26  ;;  %2473 = vmatprep.subr.mxu1 %v2858_v1 }
 0x1f0   :  { %2030 = vmatprep.subr.mxu0 %v4087_v5 }
 0x28e   :  { %v1950_v15 = vpop.f32.mrf.mxu0 }
 0x28f   :  { %v2437_v19 = vpop.f32.mrf.mxu1 }
 0x290   :  { %v733_v29 = vadd.f32 %v2437_v19, %v242_v12  ;;  %v1951_v36 = vpop.f32.mrf.mxu0 }
 0x291   :  { %v1952_v39 = vadd.f32 %v1951_v36, %v1950_v15  ;;  %v723_v42 = vpop.f32.mrf.mxu1 }
 0x292   :  { %v732_v16 = vadd.f32 %v723_v42, %v239_v28  ;;  %v1953_v22 = vpop.f32.mrf.mxu0  ;;  %2671 = vtanh.f32 %v733_v29 }
 0x293   :  { %v647_v50 = vadd.f32 %v1952_v39, %v3352_v52 }
 0x294   :  { %2673 = vtanh.f32 %v732_v16  ;;  %v1954_v8 = vpop.f32.mrf.mxu0 }
 0x295   :  { %2675 = vtanh.f32 %v647_v50  ;;  %v1955_v5 = vadd.f32 %v1954_v8, %v1953_v22  ;;  %v3503_v8 = vld [vmem:[%s4050_s3 + $0x78] sm:$0xff] }
 0x297   :  { %v652_v62 = vadd.f32 %v1955_v5, %v3352_v52 }
 0x299   :  { %2677 = vtanh.f32 %v652_v62  ;;  %v3509_v62 = vld [vmem:[%s4050_s3 + $0x70] sm:$0xff] }
 0x29f   :  { %v2672_v26 = vpop.eup %2671 }
 0x2a1   :  { %v2674_v3 = vpop.eup %2673 }
 0x2a2   :  { %v2676_v0 = vpop.eup %2675  ;;  %2470 = vmatprep.mubr.f32.mxu1 %v2674_v3 }
 0x2a3   :  { %800 = vmatprep.mubr.f32.mxu0 %v2676_v0  ;;  %2471 = vmatmul.mubr.f32.vlgmr.msra.gmra.mxu1 %v2672_v26  ;;  %v4095_v0 = vld [vmem:[#allocation7_spill] sm:$0xff] }
 0x2a4   :  { %801 = vmatmul.mubr.f32.vlgmr.msra.gmra.mxu0 %v2674_v3  ;;  %2474 = vmatpush3.msra.mxu1 %v2858_v1  ;;  %v247_v3 = vadd.f32 %v4095_v0, %v3252_v13 }
 0x2a5   :  { %2475 = vmatprep.subr.mxu1 %v2863_v2  ;;  %2031 = vmatpush3.msra.mxu0 %v3011_v30 }
 0x2a6   :  { %v2678_v12 = vpop.eup %2677  ;;  %2476 = vmatpush3.msra.mxu1 %v2863_v2  ;;  %2032 = vmatprep.subr.mxu0 %v3017_v31  ;;  %v4090_v2 = vld [vmem:[#allocation4_spill] sm:$0xff] }
 0x2a7   :  { %805 = vmatprep.mubr.f32.mxu0 %v2678_v12  ;;  %2477 = vmatprep.subr.mxu1 %v2873_v4  ;;  %v3516_v12 = vld [vmem:[%s4050_s3 + $0x68] sm:$0xff] }
 0x2a8   :  { %806 = vmatmul.mubr.f32.gmra.mxu0 %v2672_v26  ;;  %2478 = vmatpush3.msra.mxu1 %v2873_v4  ;;  %v4091_v4 = vld [vmem:[#allocation5_spill] sm:$0xff] }
 0x2a9   :  { %2033 = vmatpush3.msra.mxu0 %v3022_v32  ;;  %2479 = vmatprep.subr.mxu1 %v2883_v6 }
 0x2aa   :  { %2034 = vmatprep.subr.mxu0 %v3028_v33  ;;  %2480 = vmatpush3.msra.mxu1 %v2883_v6  ;;  %v4092_v6 = vld [vmem:[#allocation6_spill] sm:$0xff] }
 0x2ab   :  { %2035 = vmatpush3.msra.mxu0 %v3035_v34  ;;  %2481 = vmatprep.subr.mxu1 %v2890_v7 }
 0x2ac   :  { %2036 = vmatprep.subr.mxu0 %v3042_v35  ;;  %2482 = vmatpush3.msra.mxu1 %v2890_v7  ;;  %v4093_v7 = vld [vmem:[#allocation3_spill] sm:$0xff] }
 0x2ad   :  { %2037 = vmatpush3.msra.mxu0 %v3052_v37  ;;  %2483 = vmatprep.subr.mxu1 %v2900_v9 }
 0x2ae   :  { %2038 = vmatprep.subr.mxu0 %v3059_v38  ;;  %2484 = vmatpush3.msra.mxu1 %v2900_v9  ;;  %v4094_v9 = vld [vmem:[#allocation9_spill] sm:$0xff] }
 0x2af   :  { %2039 = vmatpush3.msra.mxu0 %v3069_v40  ;;  %2485 = vmatprep.subr.mxu1 %v2907_v10 }
 0x2b0   :  { %2040 = vmatprep.subr.mxu0 %v3076_v41  ;;  %2486 = vmatpush3.msra.mxu1 %v2907_v10  ;;  %v250_v10 = vadd.f32 %v4094_v9, %v3252_v13 }
 0x2b1   :  { %2041 = vmatpush3.msra.mxu0 %v3114_v43  ;;  %2487 = vmatprep.subr.mxu1 %v2913_v11 }
 0x2b2   :  { %2042 = vmatprep.subr.mxu0 %v3119_v44  ;;  %2488 = vmatpush3.msra.mxu1 %v2913_v11 }
 0x2b3   :  { %2043 = vmatpush3.msra.mxu0 %v3125_v45  ;;  %2489 = vmatprep.subr.mxu1 %v2927_v14 }
 0x2b4   :  { %2044 = vmatprep.subr.mxu0 %v3131_v46  ;;  %2490 = vmatpush3.msra.mxu1 %v2927_v14 }
 0x2b5   :  { %2045 = vmatpush3.msra.mxu0 %v3137_v47  ;;  %2491 = vmatprep.subr.mxu1 %v2940_v17 }
 0x2b6   :  { %2046 = vmatprep.subr.mxu0 %v3143_v48  ;;  %2492 = vmatpush3.msra.mxu1 %v2940_v17 }
 0x2b7   :  { %2047 = vmatpush3.msra.mxu0 %v3149_v49  ;;  %2493 = vmatprep.subr.mxu1 %v2947_v18 }
 0x2b8   :  { %2048 = vmatprep.subr.mxu0 %v3158_v51  ;;  %2494 = vmatpush3.msra.mxu1 %v2947_v18 }
 0x2b9   :  { %2049 = vmatpush3.msra.mxu0 %v3167_v53  ;;  %2495 = vmatprep.subr.mxu1 %v2957_v20 }
 0x2ba   :  { %2050 = vmatprep.subr.mxu0 %v3173_v54  ;;  %2496 = vmatpush3.msra.mxu1 %v2957_v20 }
 0x2bb   :  { %2051 = vmatpush3.msra.mxu0 %v3179_v55  ;;  %2497 = vmatprep.subr.mxu1 %v2963_v21 }
 0x2bc   :  { %2052 = vmatprep.subr.mxu0 %v3185_v56  ;;  %2498 = vmatpush3.msra.mxu1 %v2963_v21 }
 0x2bd   :  { %2053 = vmatpush3.msra.mxu0 %v3191_v57  ;;  %2499 = vmatprep.subr.mxu1 %v2974_v23 }
 0x2be   :  { %2054 = vmatprep.subr.mxu0 %v3196_v58  ;;  %2500 = vmatpush3.msra.mxu1 %v2974_v23 }
 0x2bf   :  { %2055 = vmatpush3.msra.mxu0 %v3202_v59  ;;  %2501 = vmatprep.subr.mxu1 %v2981_v24 }
 0x2c0   :  { %2056 = vmatprep.subr.mxu0 %v3208_v60  ;;  %2502 = vmatpush3.msra.mxu1 %v2981_v24 }
 0x2c1   :  { %2057 = vmatpush3.msra.mxu0 %v3214_v61  ;;  %2503 = vmatprep.subr.mxu1 %v2988_v25 }
 0x2c2   :  { %2058 = vmatprep.subr.mxu0 %v3223_v63  ;;  %2504 = vmatpush3.msra.mxu1 %v2988_v25 }
 0x2c3   :  { %2059 = vmatpush3.msra.mxu0 %v4090_v2  ;;  %2508 = vmatprep.subr.mxu1 %v2858_v1 }
 0x2c4   :  { %2060 = vmatprep.subr.mxu0 %v4091_v4 }
 0x2c5   :  { %2061 = vmatpush3.msra.mxu0 %v4092_v6 }
 0x2c6   :  { %2086 = vmatprep.subr.mxu0 %v4093_v7 }
 0x363   :  { %v2472_v11 = vpop.f32.mrf.mxu1 }
 0x364   :  { %v2006_v26 = vpop.f32.mrf.mxu0  ;;  %v889_v5 = vadd.f32 %v2472_v11, %v250_v10  ;;  %v3525_v10 = vld [vmem:[%s4050_s3 + $0x60] sm:$0xff] }
 0x365   :  { %v879_v15 = vpop.f32.mrf.mxu1 }
 0x366   :  { %v888_v19 = vadd.f32 %v879_v15, %v247_v3  ;;  %v2007_v27 = vpop.f32.mrf.mxu0 }
 0x367   :  { %v2008_v28 = vadd.f32 %v2007_v27, %v2006_v26  ;;  %v3634_v27 = vld [vmem:[%s4053_s4 + $0x70] sm:$0xff] }
 0x368   :  { %2679 = vtanh.f32 %v888_v19  ;;  %v2009_v1 = vpop.f32.mrf.mxu0  ;;  %v3626_v19 = vld [vmem:[%s4053_s4 + $0xf0] sm:$0xff] }
 0x369   :  { %2681 = vtanh.f32 %v889_v5  ;;  %v803_v29 = vadd.f32 %v2008_v28, %v3352_v52  ;;  %v3619_v5 = vld [vmem:[%s4053_s4 + $0x78] sm:$0xff]  ;;  %v3641_v28 = vld [vmem:[%s4053_s4 + $0xe8] sm:$0xff] }
 0x36a   :  { %v2010_v36 = vpop.f32.mrf.mxu0 }
 0x36b   :  { %2683 = vtanh.f32 %v803_v29  ;;  %v2011_v39 = vadd.f32 %v2010_v36, %v2009_v1  ;;  %v3648_v1 = vld [vmem:[%s4053_s4 + $0x68] sm:$0xff]  ;;  %v3655_v29 = vld [vmem:[%s4053_s4 + $0xe0] sm:$0xff] }
 0x36c   :  { %v3662_v36 = vld [vmem:[%s4053_s4 + $0x60] sm:$0xff] }
 0x36d   :  { %v808_v42 = vadd.f32 %v2011_v39, %v3352_v52  ;;  %v3669_v39 = vld [vmem:[%s4053_s4 + $0xd8] sm:$0xff] }
 0x36f   :  { %2685 = vtanh.f32 %v808_v42  ;;  %v3676_v42 = vld [vmem:[%s4053_s4 + $0x58] sm:$0xff] }
 0x375   :  { %v2680_v16 = vpop.eup %2679 }
 0x376   :  { %v2682_v22 = vpop.eup %2681  ;;  %2505 = vmatprep.mubr.f32.mxu1 %v2680_v16 }
 0x377   :  { %2506 = vmatmul.mubr.f32.vlgmr.msra.gmra.mxu1 %v2682_v22 }
 0x378   :  { %v2684_v50 = vpop.eup %2683  ;;  %2509 = vmatpush3.msra.mxu1 %v3503_v8 }
 0x379   :  { %956 = vmatprep.mubr.f32.mxu0 %v2684_v50  ;;  %2510 = vmatprep.subr.mxu1 %v3509_v62  ;;  %v3696_v50 = vld [vmem:[%s4050_s3 + $0x30] sm:$0xff] }
 0x37a   :  { %957 = vmatmul.mubr.f32.vlgmr.msra.gmra.mxu0 %v2680_v16  ;;  %2511 = vmatpush3.msra.mxu1 %v3509_v62  ;;  %v3682_v16 = vld [vmem:[%s4050_s3 + $0x38] sm:$0xff] }
 0x37b   :  { %2512 = vmatprep.subr.mxu1 %v3516_v12  ;;  %2087 = vmatpush3.msra.mxu0 %v3011_v30  ;;  %v3533_v30 = vld [vmem:[%s4050_s3 + $0x58] sm:$0xff] }
 0x37c   :  { %v2686_v9 = vpop.eup %2685  ;;  %2513 = vmatpush3.msra.mxu1 %v3516_v12  ;;  %2088 = vmatprep.subr.mxu0 %v3017_v31  ;;  %v3542_v31 = vld [vmem:[%s4050_s3 + $0x50] sm:$0xff] }
 0x37d   :  { %961 = vmatprep.mubr.f32.mxu0 %v2686_v9  ;;  %2514 = vmatprep.subr.mxu1 %v3525_v10  ;;  %v3705_v9 = vld [vmem:[%s4050_s3 + $0x28] sm:$0xff] }
 0x37e   :  { %962 = vmatmul.mubr.f32.gmra.mxu0 %v2682_v22  ;;  %2515 = vmatpush3.msra.mxu1 %v3525_v10  ;;  %v3688_v22 = vld [vmem:[%s4053_s4 + $0xd0] sm:$0xff] }
 0x37f   :  { %2089 = vmatpush3.msra.mxu0 %v3022_v32  ;;  %2516 = vmatprep.subr.mxu1 %v3533_v30  ;;  %v3551_v32 = vld [vmem:[%s4050_s3 + $0x48] sm:$0xff] }
 0x380   :  { %2090 = vmatprep.subr.mxu0 %v3028_v33  ;;  %2517 = vmatpush3.msra.mxu1 %v3533_v30  ;;  %v3560_v33 = vld [vmem:[%s4050_s3 + $0x40] sm:$0xff] }
 0x381   :  { %2091 = vmatpush3.msra.mxu0 %v3035_v34  ;;  %2518 = vmatprep.subr.mxu1 %v3542_v31 }
 0x382   :  { %2092 = vmatprep.subr.mxu0 %v3042_v35  ;;  %2519 = vmatpush3.msra.mxu1 %v3542_v31 }
 0x383   :  { %2093 = vmatpush3.msra.mxu0 %v3052_v37  ;;  %2520 = vmatprep.subr.mxu1 %v3551_v32 }
 0x384   :  { %2094 = vmatprep.subr.mxu0 %v3059_v38  ;;  %2521 = vmatpush3.msra.mxu1 %v3551_v32 }
 0x385   :  { %2095 = vmatpush3.msra.mxu0 %v3069_v40  ;;  %2522 = vmatprep.subr.mxu1 %v3560_v33 }
 0x386   :  { %2096 = vmatprep.subr.mxu0 %v3076_v41  ;;  %2523 = vmatpush3.msra.mxu1 %v3560_v33 }
 0x387   :  { %2097 = vmatpush3.msra.mxu0 %v3114_v43  ;;  %2524 = vmatprep.subr.mxu1 %v2927_v14 }
 0x388   :  { %2098 = vmatprep.subr.mxu0 %v3119_v44  ;;  %2525 = vmatpush3.msra.mxu1 %v2927_v14  ;;  %v4096_v14 = vld [vmem:[#allocation14_spill] sm:$0xff] }
 0x389   :  { %2099 = vmatpush3.msra.mxu0 %v3125_v45  ;;  %2526 = vmatprep.subr.mxu1 %v2940_v17 }
 0x38a   :  { %2100 = vmatprep.subr.mxu0 %v3131_v46  ;;  %2527 = vmatpush3.msra.mxu1 %v2940_v17  ;;  %v258_v17 = vadd.f32 %v3252_v13, %v4096_v14 }
 0x38b   :  { %2101 = vmatpush3.msra.mxu0 %v3137_v47  ;;  %2528 = vmatprep.subr.mxu1 %v2947_v18 }
 0x38c   :  { %2102 = vmatprep.subr.mxu0 %v3143_v48  ;;  %2529 = vmatpush3.msra.mxu1 %v2947_v18 }
 0x38d   :  { %2103 = vmatpush3.msra.mxu0 %v3149_v49  ;;  %2530 = vmatprep.subr.mxu1 %v2957_v20 }
 0x38e   :  { %2104 = vmatprep.subr.mxu0 %v3158_v51  ;;  %2531 = vmatpush3.msra.mxu1 %v2957_v20  ;;  %v4097_v20 = vld [vmem:[#allocation12_spill] sm:$0xff] }
 0x38f   :  { %2105 = vmatpush3.msra.mxu0 %v3167_v53  ;;  %2532 = vmatprep.subr.mxu1 %v2963_v21 }
 0x390   :  { %2106 = vmatprep.subr.mxu0 %v3173_v54  ;;  %2533 = vmatpush3.msra.mxu1 %v2963_v21  ;;  %v255_v21 = vadd.f32 %v3252_v13, %v4097_v20  ;;  %v3856_v20 = vld [vmem:[%s4053_s4 + $0xb0] sm:$0xff] }
 0x391   :  { %2107 = vmatpush3.msra.mxu0 %v3179_v55  ;;  %2534 = vmatprep.subr.mxu1 %v2974_v23 }
 0x392   :  { %2108 = vmatprep.subr.mxu0 %v3185_v56  ;;  %2535 = vmatpush3.msra.mxu1 %v2974_v23 }
 0x393   :  { %2109 = vmatpush3.msra.mxu0 %v3191_v57  ;;  %2536 = vmatprep.subr.mxu1 %v2981_v24 }
 0x394   :  { %2110 = vmatprep.subr.mxu0 %v3196_v58  ;;  %2537 = vmatpush3.msra.mxu1 %v2981_v24 }
 0x395   :  { %2111 = vmatpush3.msra.mxu0 %v3202_v59  ;;  %2538 = vmatprep.subr.mxu1 %v2988_v25 }
 0x396   :  { %2112 = vmatprep.subr.mxu0 %v3208_v60  ;;  %2539 = vmatpush3.msra.mxu1 %v2988_v25 }
 0x397   :  { %2113 = vmatpush3.msra.mxu0 %v3214_v61  ;;  %2543 = vmatprep.subr.mxu1 %v3503_v8 }
 0x398   :  { %2114 = vmatprep.subr.mxu0 %v3223_v63 }
 0x399   :  { %2115 = vmatpush3.msra.mxu0 %v4090_v2 }
 0x39a   :  { %2116 = vmatprep.subr.mxu0 %v4091_v4 }
 0x39b   :  { %2117 = vmatpush3.msra.mxu0 %v4092_v6 }
 0x39c   :  { %2142 = vmatprep.subr.mxu0 %v4093_v7 }
 0x437   :  { %v2507_v18 = vpop.f32.mrf.mxu1 }
 0x438   :  { %v1045_v23 = vadd.f32 %v2507_v18, %v258_v17 }
 0x439   :  { %v1035_v24 = vpop.f32.mrf.mxu1 }
 0x43a   :  { %v1044_v25 = vadd.f32 %v1035_v24, %v255_v21  ;;  %v2062_v34 = vpop.f32.mrf.mxu0  ;;  %v3863_v21 = vld [vmem:[%s4053_s4 + $0x30] sm:$0xff]  ;;  %v3877_v24 = vld [vmem:[%s4053_s4 + $0x28] sm:$0xff] }
 0x43c   :  { %2687 = vtanh.f32 %v1044_v25  ;;  %v2063_v35 = vpop.f32.mrf.mxu0  ;;  %v3884_v25 = vld [vmem:[%s4053_s4 + $0xa0] sm:$0xff] }
 0x43d   :  { %2689 = vtanh.f32 %v1045_v23  ;;  %v2064_v37 = vadd.f32 %v2063_v35, %v2062_v34  ;;  %v3870_v23 = vld [vmem:[%s4053_s4 + $0xa8] sm:$0xff]  ;;  %v3891_v34 = vld [vmem:[%s4053_s4 + $0x20] sm:$0xff]  ;;  %v3897_v35 = vld [vmem:[%s4053_s4 + $0x98] sm:$0xff] }
 0x43e   :  { %v2065_v38 = vpop.f32.mrf.mxu0 }
 0x43f   :  { %v959_v40 = vadd.f32 %v2064_v37, %v3352_v52  ;;  %v3903_v37 = vld [vmem:[%s4053_s4 + $0x18] sm:$0xff] }
 0x440   :  { %v2066_v41 = vpop.f32.mrf.mxu0 }
 0x441   :  { %2691 = vtanh.f32 %v959_v40  ;;  %v2067_v7 = vadd.f32 %v2066_v41, %v2065_v38  ;;  %v3909_v38 = vld [vmem:[%s4053_s4 + $0x90] sm:$0xff]  ;;  %v3921_v41 = vld [vmem:[%s4053_s4 + $0x88] sm:$0xff] }
 0x442   :  { %v3915_v40 = vld [vmem:[%s4053_s4 + $0x10] sm:$0xff] }
 0x443   :  { %v964_v11 = vadd.f32 %v2067_v7, %v3352_v52  ;;  %v3927_v7 = vld [vmem:[%s4053_s4 + $0x8] sm:$0xff] }
 0x445   :  { %2693 = vtanh.f32 %v964_v11  ;;  %v2781_v11 = vld [vmem:[%s4053_s4 + $0x80] sm:$0xff] }
 0x449   :  { %v2688_v0 = vpop.eup %2687 }
 0x44a   :  { %v2690_v3 = vpop.eup %2689  ;;  %2540 = vmatprep.mubr.f32.mxu1 %v2688_v0 }
 0x44b   :  { %2541 = vmatmul.mubr.f32.vlgmr.msra.gmra.mxu1 %v2690_v3 }
 0x44c   :  { %2544 = vmatpush3.msra.mxu1 %v3503_v8 }
 0x44d   :  { %2545 = vmatprep.subr.mxu1 %v3509_v62 }
 0x44e   :  { %v2692_v26 = vpop.eup %2691  ;;  %2546 = vmatpush3.msra.mxu1 %v3509_v62 }
 0x44f   :  { %1112 = vmatprep.mubr.f32.mxu0 %v2692_v26  ;;  %2547 = vmatprep.subr.mxu1 %v3516_v12  ;;  %v4100_v26 = vld [vmem:[#allocation18_spill] sm:$0xff] }
 0x450   :  { %1113 = vmatmul.mubr.f32.vlgmr.msra.gmra.mxu0 %v2688_v0  ;;  %2548 = vmatpush3.msra.mxu1 %v3516_v12  ;;  %v2782_v0 = vld [vmem:[%s4053_s4] sm:$0xff] }
 0x451   :  { %2549 = vmatprep.subr.mxu1 %v3525_v10  ;;  %2143 = vmatpush3.msra.mxu0 %v3619_v5 }
 0x452   :  { %v2694_v15 = vpop.eup %2693  ;;  %2550 = vmatpush3.msra.mxu1 %v3525_v10  ;;  %2144 = vmatprep.subr.mxu0 %v3626_v19 }
 0x453   :  { %1117 = vmatprep.mubr.f32.mxu0 %v2694_v15  ;;  %2551 = vmatprep.subr.mxu1 %v3533_v30 }
 0x454   :  { %1118 = vmatmul.mubr.f32.gmra.mxu0 %v2690_v3  ;;  %2552 = vmatpush3.msra.mxu1 %v3533_v30  ;;  %v2783_v3 = vld [vmem:[%s4054_s2] ss:$0 sm:$0xff] }
 0x455   :  { %2145 = vmatpush3.msra.mxu0 %v3634_v27  ;;  %2553 = vmatprep.subr.mxu1 %v3542_v31  ;;  %v274_v15 = vadd.f32 %v2783_v3, %v4100_v26 }
 0x456   :  { %2146 = vmatprep.subr.mxu0 %v3641_v28  ;;  %2554 = vmatpush3.msra.mxu1 %v3542_v31 }
 0x457   :  { %2147 = vmatpush3.msra.mxu0 %v3648_v1  ;;  %2555 = vmatprep.subr.mxu1 %v3551_v32 }
 0x458   :  { %2148 = vmatprep.subr.mxu0 %v3655_v29  ;;  %2556 = vmatpush3.msra.mxu1 %v3551_v32 }
 0x459   :  { %2149 = vmatpush3.msra.mxu0 %v3662_v36  ;;  %2557 = vmatprep.subr.mxu1 %v3560_v33 }
 0x45a   :  { %2150 = vmatprep.subr.mxu0 %v3669_v39  ;;  %2558 = vmatpush3.msra.mxu1 %v3560_v33 }
 0x45b   :  { %2151 = vmatpush3.msra.mxu0 %v3676_v42  ;;  %2559 = vmatprep.subr.mxu1 %v3682_v16 }
 0x45c   :  { %2152 = vmatprep.subr.mxu0 %v3688_v22  ;;  %2560 = vmatpush3.msra.mxu1 %v3682_v16 }
 0x45d   :  { %2153 = vmatpush3.msra.mxu0 %v3114_v43  ;;  %2561 = vmatprep.subr.mxu1 %v3696_v50  ;;  %v3714_v43 = vld [vmem:[%s4050_s3 + $0x20] sm:$0xff] }
 0x45e   :  { %2154 = vmatprep.subr.mxu0 %v3119_v44  ;;  %2562 = vmatpush3.msra.mxu1 %v3696_v50  ;;  %v3723_v44 = vld [vmem:[%s4050_s3 + $0x18] sm:$0xff] }
 0x45f   :  { %2155 = vmatpush3.msra.mxu0 %v3125_v45  ;;  %2563 = vmatprep.subr.mxu1 %v3705_v9  ;;  %v3732_v45 = vld [vmem:[%s4050_s3 + $0x10] sm:$0xff] }
 0x460   :  { %2156 = vmatprep.subr.mxu0 %v3131_v46  ;;  %2564 = vmatpush3.msra.mxu1 %v3705_v9  ;;  %v3741_v46 = vld [vmem:[%s4050_s3 + $0x8] sm:$0xff] }
 0x461   :  { %2157 = vmatpush3.msra.mxu0 %v3137_v47  ;;  %2565 = vmatprep.subr.mxu1 %v3714_v43  ;;  %v3750_v47 = vld [vmem:[%s4050_s3] sm:$0xff] }
 0x462   :  { %2158 = vmatprep.subr.mxu0 %v3143_v48  ;;  %2566 = vmatpush3.msra.mxu1 %v3714_v43  ;;  %v3766_v48 = vld [vmem:[%s4053_s4 + $0xf8] sm:$0xff] }
 0x463   :  { %2159 = vmatpush3.msra.mxu0 %v3149_v49  ;;  %2567 = vmatprep.subr.mxu1 %v3723_v44  ;;  %v4098_v49 = vld [vmem:[#allocation13_spill] sm:$0xff] }
 0x464   :  { %2160 = vmatprep.subr.mxu0 %v3158_v51  ;;  %2568 = vmatpush3.msra.mxu1 %v3723_v44  ;;  %v266_v51 = vadd.f32 %v4098_v49, %v3252_v13 }
 0x465   :  { %2161 = vmatpush3.msra.mxu0 %v3167_v53  ;;  %2569 = vmatprep.subr.mxu1 %v3732_v45 }
 0x466   :  { %2162 = vmatprep.subr.mxu0 %v3173_v54  ;;  %2570 = vmatpush3.msra.mxu1 %v3732_v45  ;;  %v4099_v54 = vld [vmem:[#allocation11_spill] sm:$0xff] }
 0x467   :  { %2163 = vmatpush3.msra.mxu0 %v3179_v55  ;;  %2571 = vmatprep.subr.mxu1 %v3741_v46  ;;  %v263_v55 = vadd.f32 %v4099_v54, %v3252_v13 }
 0x468   :  { %2164 = vmatprep.subr.mxu0 %v3185_v56  ;;  %2572 = vmatpush3.msra.mxu1 %v3741_v46 }
 0x469   :  { %2165 = vmatpush3.msra.mxu0 %v3191_v57  ;;  %2573 = vmatprep.subr.mxu1 %v3750_v47 }
 0x46a   :  { %2166 = vmatprep.subr.mxu0 %v3196_v58  ;;  %2574 = vmatpush3.msra.mxu1 %v3750_v47 }
 0x46b   :  { %2167 = vmatpush3.msra.mxu0 %v3202_v59  ;;  %2578 = vmatprep.subr.mxu1 %v3503_v8 }
 0x46c   :  { %2168 = vmatprep.subr.mxu0 %v3208_v60 }
 0x46d   :  { %2169 = vmatpush3.msra.mxu0 %v3214_v61 }
 0x46e   :  { %2170 = vmatprep.subr.mxu0 %v3223_v63 }
 0x46f   :  { %2171 = vmatpush3.msra.mxu0 %v4090_v2 }
 0x470   :  { %2172 = vmatprep.subr.mxu0 %v4091_v4 }
 0x471   :  { %2173 = vmatpush3.msra.mxu0 %v4092_v6 }
 0x472   :  { %2198 = vmatprep.subr.mxu0 %v3766_v48 }
 0x50b   :  { %v2542_v53 = vpop.f32.mrf.mxu1 }
 0x50c   :  { %v1201_v56 = vadd.f32 %v2542_v53, %v266_v51 }
 0x50d   :  { %v1191_v57 = vpop.f32.mrf.mxu1 }
 0x50e   :  { %v1200_v58 = vadd.f32 %v1191_v57, %v263_v55 }
 0x510   :  { %2695 = vtanh.f32 %v1200_v58  ;;  %v2118_v59 = vpop.f32.mrf.mxu0 }
 0x511   :  { %2697 = vtanh.f32 %v1201_v56 }
 0x512   :  { %v2119_v60 = vpop.f32.mrf.mxu0 }
 0x513   :  { %v2120_v61 = vadd.f32 %v2119_v60, %v2118_v59 }
 0x514   :  { %v2121_v63 = vpop.f32.mrf.mxu0 }
 0x515   :  { %v1115_v2 = vadd.f32 %v2120_v61, %v3352_v52  ;;  %v2784_v61 = vld [vmem:[%s4055_s5] ss:$0 sm:$0xff] }
 0x516   :  { %v2122_v4 = vpop.f32.mrf.mxu0 }
 0x517   :  { %2699 = vtanh.f32 %v1115_v2  ;;  %v2123_v6 = vadd.f32 %v2122_v4, %v2121_v63 }
 0x519   :  { %v1120_v14 = vadd.f32 %v2123_v6, %v3352_v52 }
 0x51b   :  { %2701 = vtanh.f32 %v1120_v14 }
 0x51d   :  { %v2696_v17 = vpop.eup %2695 }
 0x51e   :  { %v2698_v18 = vpop.eup %2697  ;;  %2575 = vmatprep.mubr.f32.mxu1 %v2696_v17 }
 0x51f   :  { %2576 = vmatmul.mubr.f32.vlgmr.msra.gmra.mxu1 %v2698_v18 }
 0x520   :  { %2579 = vmatpush3.msra.mxu1 %v3503_v8 }
 0x521   :  { %2580 = vmatprep.subr.mxu1 %v3509_v62 }
 0x522   :  { %2581 = vmatpush3.msra.mxu1 %v3509_v62  ;;  %v3807_v62 = vld [vmem:[%s4053_s4 + $0x50] sm:$0xff] }
 0x523   :  { %2582 = vmatprep.subr.mxu1 %v3516_v12 }
 0x524   :  { %v2700_v13 = vpop.eup %2699  ;;  %2583 = vmatpush3.msra.mxu1 %v3516_v12  ;;  %v3814_v12 = vld [vmem:[%s4053_s4 + $0xc8] sm:$0xff] }
 0x525   :  { %1268 = vmatprep.mubr.f32.mxu0 %v2700_v13  ;;  %2584 = vmatprep.subr.mxu1 %v3525_v10 }
 0x526   :  { %1269 = vmatmul.mubr.f32.vlgmr.msra.gmra.mxu0 %v2696_v17  ;;  %2585 = vmatpush3.msra.mxu1 %v3525_v10  ;;  %v3821_v10 = vld [vmem:[%s4053_s4 + $0x48] sm:$0xff] }
 0x527   :  { %2586 = vmatprep.subr.mxu1 %v3533_v30  ;;  %2199 = vmatpush3.msra.mxu0 %v3619_v5 }
 0x528   :  { %v2702_v8 = vpop.eup %2701  ;;  %2587 = vmatpush3.msra.mxu1 %v3533_v30  ;;  %2200 = vmatprep.subr.mxu0 %v3626_v19  ;;  %v3828_v30 = vld [vmem:[%s4053_s4 + $0xc0] sm:$0xff] }
 0x529   :  { %1273 = vmatprep.mubr.f32.mxu0 %v2702_v8  ;;  %2588 = vmatprep.subr.mxu1 %v3542_v31 }
 0x52a   :  { %1274 = vmatmul.mubr.f32.gmra.mxu0 %v2698_v18  ;;  %2589 = vmatpush3.msra.mxu1 %v3542_v31  ;;  %v3835_v31 = vld [vmem:[%s4053_s4 + $0x40] sm:$0xff] }
 0x52b   :  { %2201 = vmatpush3.msra.mxu0 %v3634_v27  ;;  %2590 = vmatprep.subr.mxu1 %v3551_v32 }
 0x52c   :  { %2202 = vmatprep.subr.mxu0 %v3641_v28  ;;  %2591 = vmatpush3.msra.mxu1 %v3551_v32  ;;  %v3842_v32 = vld [vmem:[%s4053_s4 + $0xb8] sm:$0xff] }
 0x52d   :  { %2203 = vmatpush3.msra.mxu0 %v3648_v1  ;;  %2592 = vmatprep.subr.mxu1 %v3560_v33 }
 0x52e   :  { %2204 = vmatprep.subr.mxu0 %v3655_v29  ;;  %2593 = vmatpush3.msra.mxu1 %v3560_v33  ;;  %v3849_v33 = vld [vmem:[%s4053_s4 + $0x38] sm:$0xff] }
 0x52f   :  { %2205 = vmatpush3.msra.mxu0 %v3662_v36  ;;  %2594 = vmatprep.subr.mxu1 %v3682_v16 }
 0x530   :  { %2206 = vmatprep.subr.mxu0 %v3669_v39  ;;  %2595 = vmatpush3.msra.mxu1 %v3682_v16 }
 0x531   :  { %2207 = vmatpush3.msra.mxu0 %v3676_v42  ;;  %2596 = vmatprep.subr.mxu1 %v3696_v50 }
 0x532   :  { %2208 = vmatprep.subr.mxu0 %v3688_v22  ;;  %2597 = vmatpush3.msra.mxu1 %v3696_v50  ;;  %v4101_v50 = vld [vmem:[#allocation16_spill] sm:$0xff] }
 0x533   :  { %2209 = vmatpush3.msra.mxu0 %v3807_v62  ;;  %2598 = vmatprep.subr.mxu1 %v3705_v9 }
 0x534   :  { %2210 = vmatprep.subr.mxu0 %v3814_v12  ;;  %2599 = vmatpush3.msra.mxu1 %v3705_v9  ;;  %v271_v9 = vadd.f32 %v2783_v3, %v4101_v50  ;;  %v2652_v50 = vld [vmem:[%s4057_s8 + $0x30] sm:$0xff]  }
 0x535   :  { %2211 = vmatpush3.msra.mxu0 %v3821_v10  ;;  %2600 = vmatprep.subr.mxu1 %v3714_v43 }
 0x536   :  { %2212 = vmatprep.subr.mxu0 %v3828_v30  ;;  %2601 = vmatpush3.msra.mxu1 %v3714_v43 }
 0x537   :  { %2213 = vmatpush3.msra.mxu0 %v3835_v31  ;;  %2602 = vmatprep.subr.mxu1 %v3723_v44 }
 0x538   :  { %2214 = vmatprep.subr.mxu0 %v3842_v32  ;;  %2603 = vmatpush3.msra.mxu1 %v3723_v44 }
 0x539   :  { %2215 = vmatpush3.msra.mxu0 %v3849_v33  ;;  %2604 = vmatprep.subr.mxu1 %v3732_v45 }
 0x53a   :  { %2216 = vmatprep.subr.mxu0 %v3856_v20  ;;  %2605 = vmatpush3.msra.mxu1 %v3732_v45 }
 0x53b   :  { %2217 = vmatpush3.msra.mxu0 %v3863_v21  ;;  %2606 = vmatprep.subr.mxu1 %v3741_v46 }
 0x53c   :  { %2218 = vmatprep.subr.mxu0 %v3870_v23  ;;  %2607 = vmatpush3.msra.mxu1 %v3741_v46 }
 0x53d   :  { %2219 = vmatpush3.msra.mxu0 %v3877_v24  ;;  %2608 = vmatprep.subr.mxu1 %v3750_v47 }
 0x53e   :  { %2220 = vmatprep.subr.mxu0 %v3884_v25  ;;  %2609 = vmatpush3.msra.mxu1 %v3750_v47 }
 0x53f   :  { %2221 = vmatpush3.msra.mxu0 %v3891_v34 }
 0x540   :  { %2222 = vmatprep.subr.mxu0 %v3897_v35 }
 0x541   :  { %2223 = vmatpush3.msra.mxu0 %v3903_v37 }
 0x542   :  { %2224 = vmatprep.subr.mxu0 %v3909_v38 }
 0x543   :  { %2225 = vmatpush3.msra.mxu0 %v3915_v40 }
 0x544   :  { %2226 = vmatprep.subr.mxu0 %v3921_v41 }
 0x545   :  { %2227 = vmatpush3.msra.mxu0 %v3927_v7 }
 0x546   :  { %2228 = vmatprep.subr.mxu0 %v2781_v11 }
 0x547   :  { %2229 = vmatpush3.msra.mxu0 %v2782_v0 }
 0x548   :  { %2254 = vmatprep.subr.mxu0 %v3766_v48 }
 0x5df   :  { %v2577_v16 = vpop.f32.mrf.mxu1 }
 0x5e0   :  { %v1357_v43 = vadd.f32 %v2577_v16, %v274_v15 }
 0x5e1   :  { %v1347_v44 = vpop.f32.mrf.mxu1 }
 0x5e2   :  { %v1356_v45 = vadd.f32 %v1347_v44, %v271_v9  ;;  %v2653_v9 = vld [vmem:[%s4057_s8 + $0x28] sm:$0xff]   ;;  %v2655_v44 = vld [vmem:[%s4057_s8 + $0x18] sm:$0xff]  }
 0x5e4   :  { %2703 = vtanh.f32 %v1356_v45  ;;  %v2656_v45 = vld [vmem:[%s4057_s8 + $0x10] sm:$0xff]  }
 0x5e5   :  { %2705 = vtanh.f32 %v1357_v43  ;;  %v2654_v43 = vld [vmem:[%s4057_s8 + $0x20] sm:$0xff]  }
 0x5e6   :  { %v2174_v46 = vpop.f32.mrf.mxu0 }
 0x5e8   :  { %v2175_v47 = vpop.f32.mrf.mxu0 }
 0x5e9   :  { %v2176_v49 = vadd.f32 %v2175_v47, %v2174_v46  ;;  %v2657_v46 = vld [vmem:[%s4057_s8 + $0x8] sm:$0xff]   ;;  %v2658_v47 = vld [vmem:[%s4057_s8] sm:$0xff]  }
 0x5ea   :  { %v2177_v51 = vpop.f32.mrf.mxu0 }
 0x5eb   :  { %v1271_v48 = vadd.f32 %v2176_v49, %v3352_v52 }
 0x5ec   :  { %v2178_v53 = vpop.f32.mrf.mxu0 }
 0x5ed   :  { %2707 = vtanh.f32 %v1271_v48  ;;  %v2179_v54 = vadd.f32 %v2178_v53, %v2177_v51 }
 0x5ef   :  { %v1276_v55 = vadd.f32 %v2179_v54, %v3352_v52  ;;  %v4102_v52 = vld [vmem:[#allocation17_spill] sm:$0xff] }
 0x5f1   :  { %v2704_v56 = vpop.eup %2703  ;;  %2709 = vtanh.f32 %v1276_v55 }
 0x5f2   :  { %v2706_v57 = vpop.eup %2705  ;;  %2610 = vmatprep.mubr.f32.mxu1 %v2704_v56 }
 0x5f3   :  { %2611 = vmatmul.mubr.f32.vlgmr.msra.gmra.mxu1 %v2706_v57 }
 0x5fa   :  { %v2708_v58 = vpop.eup %2707 }
 0x5fb   :  { %1424 = vmatprep.mubr.f32.mxu0 %v2708_v58  ;;  %v1817_v58 = vld [vmem:[%s4058_s6] ss:$0 sm:$0xff] }
 0x5fc   :  { %1425 = vmatmul.mubr.f32.vlgmr.msra.gmra.mxu0 %v2704_v56 }
 0x5fd   :  { %2255 = vmatpush3.msra.mxu0 %v3619_v5  ;;  %v282_v5 = vadd.f32 %v2783_v3, %v4102_v52 }
 0x5fe   :  { %v2710_v59 = vpop.eup %2709  ;;  %2256 = vmatprep.subr.mxu0 %v3626_v19 }
 0x5ff   :  { %1429 = vmatprep.mubr.f32.mxu0 %v2710_v59  ;;  %2257 = vmatpush3.msra.mxu0 %v3634_v27  ;;  %v4103_v27 = vld [vmem:[#allocation15_spill] sm:$0xff] }
 0x600   :  { %1430 = vmatmul.mubr.f32.gmra.mxu0 %v2706_v57  ;;  %2258 = vmatprep.subr.mxu0 %v3641_v28  ;;  %v279_v28 = vadd.f32 %v2783_v3, %v4103_v27 }
 0x601   :  { %2259 = vmatpush3.msra.mxu0 %v3648_v1 }
 0x602   :  { %2260 = vmatprep.subr.mxu0 %v3655_v29 }
 0x603   :  { %2261 = vmatpush3.msra.mxu0 %v3662_v36 }
 0x604   :  { %2262 = vmatprep.subr.mxu0 %v3669_v39 }
 0x605   :  { %2263 = vmatpush3.msra.mxu0 %v3676_v42 }
 0x606   :  { %2264 = vmatprep.subr.mxu0 %v3688_v22 }
 0x607   :  { %2265 = vmatpush3.msra.mxu0 %v3807_v62 }
 0x608   :  { %2266 = vmatprep.subr.mxu0 %v3814_v12 }
 0x609   :  { %2267 = vmatpush3.msra.mxu0 %v3821_v10 }
 0x60a   :  { %2268 = vmatprep.subr.mxu0 %v3828_v30 }
 0x60b   :  { %2269 = vmatpush3.msra.mxu0 %v3835_v31 }
 0x60c   :  { %2270 = vmatprep.subr.mxu0 %v3842_v32 }
 0x60d   :  { %2271 = vmatpush3.msra.mxu0 %v3849_v33 }
 0x60e   :  { %2272 = vmatprep.subr.mxu0 %v3856_v20  ;;  %v1602_v20 = vlaneseq }
 0x60f   :  { %2273 = vmatpush3.msra.mxu0 %v3863_v21 }
 0x610   :  { %2274 = vmatprep.subr.mxu0 %v3870_v23  ;;  %v3984_v21 = vand.u32 127, %v1602_v20 }
 0x611   :  { %2275 = vmatpush3.msra.mxu0 %v3877_v24 }
 0x612   :  { %2276 = vmatprep.subr.mxu0 %v3884_v25  ;;  %vm1604_vm0 = vcmp.lt.s32.totalorder %v3984_v21, 32  ;;  %vm1760_vm2 = vcmp.lt.s32.totalorder %v3984_v21, 64 }
 0x613   :  { %2277 = vmatpush3.msra.mxu0 %v3891_v34 }
 0x614   :  { %2278 = vmatprep.subr.mxu0 %v3897_v35  ;;  %v2785_v35 = vmov 0.0  }
 0x615   :  { %2279 = vmatpush3.msra.mxu0 %v3903_v37  ;;  %2613 = vmatprep.subr.bf16.mxu1 %v2785_v35  ;;  %v2651_v37 = vld [vmem:[%s4057_s8 + $0x38] sm:$0xff]  }
 0x616   :  { %2280 = vmatprep.subr.mxu0 %v3909_v38  ;;  %2614 = vmatpush3.bf16.msra.mxu1 %v2651_v37 }
 0x617   :  { %2281 = vmatpush3.msra.mxu0 %v3915_v40  ;;  %2615 = vmatprep.subr.bf16.mxu1 %v2785_v35 }
 0x618   :  { %2282 = vmatprep.subr.mxu0 %v3921_v41  ;;  %2629 = vmatprep.mubr.msk.bf16.mxu1 %vm2786_vm1, %v2785_v35 }
 0x619   :  { %2283 = vmatpush3.msra.mxu0 %v3927_v7 }
 0x61a   :  { %2284 = vmatprep.subr.mxu0 %v2781_v11  ;;  %2616 = vmatpush3.bf16.msra.mxu1 %v2652_v50 }
 0x61b   :  { %2285 = vmatpush3.msra.mxu0 %v2782_v0  ;;  %2617 = vmatprep.subr.bf16.mxu1 %v2785_v35 }
 0x61e   :  { %2618 = vmatpush3.bf16.msra.mxu1 %v2653_v9 }
 0x61f   :  { %2619 = vmatprep.subr.bf16.mxu1 %v2785_v35 }
 0x622   :  { %2620 = vmatpush3.bf16.msra.mxu1 %v2654_v43 }
 0x623   :  { %2621 = vmatprep.subr.bf16.mxu1 %v2785_v35 }
 0x626   :  { %2622 = vmatpush3.bf16.msra.mxu1 %v2655_v44 }
 0x627   :  { %2623 = vmatprep.subr.bf16.mxu1 %v2785_v35 }
 0x62a   :  { %2624 = vmatpush3.bf16.msra.mxu1 %v2656_v45 }
 0x62b   :  { %2625 = vmatprep.subr.bf16.mxu1 %v2785_v35 }
 0x62e   :  { %2626 = vmatpush3.bf16.msra.mxu1 %v2657_v46 }
 0x62f   :  { %2627 = vmatprep.subr.bf16.mxu1 %v2785_v35 }
 0x632   :  { %2628 = vmatpush3.bf16.msra.mxu1 %v2658_v47 }
 0x6b3   :  { %v2612_v19 = vpop.f32.mrf.mxu1 }
 0x6b4   :  { %v1513_v1 = vadd.f32 %v2612_v19, %v282_v5  ;;  %v1818_v19 = vld [vmem:[%s4059_s7] ss:$0 sm:$0xff] }
 0x6b5   :  { %v1503_v29 = vpop.f32.mrf.mxu1 }
 0x6b6   :  { %2711 = vtanh.f32 %v1513_v1  ;;  %v1512_v36 = vadd.f32 %v1503_v29, %v279_v28 }
 0x6b8   :  { %2713 = vtanh.f32 %v1512_v36  ;;  %v1819_v36 = vld [vmem:[%s4060_s9] ss:$0 sm:$0xff] }
 0x6bc   :  { %v2230_v39 = vpop.f32.mrf.mxu0 }
 0x6be   :  { %v2231_v42 = vpop.f32.mrf.mxu0 }
 0x6bf   :  { %v2232_v22 = vadd.f32 %v2231_v42, %v2230_v39 }
 0x6c0   :  { %v2233_v60 = vpop.f32.mrf.mxu0 }
 0x6c1   :  { %v1427_v63 = vadd.f32 %v2784_v61, %v2232_v22 }
 0x6c2   :  { %v2234_v2 = vpop.f32.mrf.mxu0 }
 0x6c3   :  { %v2712_v4 = vpop.eup %2711  ;;  %2715 = vtanh.f32 %v1427_v63  ;;  %v2235_v6 = vadd.f32 %v2234_v2, %v2233_v60 }
 0x6c4   :  { %1594 = vst [vmem:[%s4056_s12 + $0x8] sm:$0xff] %v2712_v4 }
 0x6c5   :  { %v2714_v14 = vpop.eup %2713  ;;  %v1432_v17 = vadd.f32 %v2784_v61, %v2235_v6 }
 0x6c6   :  { %1593 = vst [vmem:[%s4056_s12] sm:$0xff] %v2714_v14 }
 0x6c7   :  { %2717 = vtanh.f32 %v1432_v17 }
 0x6d0   :  { %v2716_v18 = vpop.eup %2715 }
 0x6d1   :  { %1580 = vmatprep.mubr.f32.mxu0 %v2716_v18 }
 0x6d2   :  { %1581 = vmatmul.mubr.f32.vlgmr.msra.gmra.mxu0 %v2714_v14 }
 0x6d4   :  { %v2718_v13 = vpop.eup %2717 }
 0x6d5   :  { %1585 = vmatprep.mubr.f32.mxu0 %v2718_v13 }
 0x6d6   :  { %1586 = vmatmul.mubr.f32.gmra.mxu0 %v2712_v4 }
 0x792   :  { %v2286_v8 = vpop.f32.mrf.mxu0 }
 0x794   :  { %v2287_v62 = vpop.f32.mrf.mxu0 }
 0x795   :  { %v2288_v12 = vadd.f32 %v2287_v62, %v2286_v8 }
 0x796   :  { %v2289_v10 = vpop.f32.mrf.mxu0 }
 0x797   :  { %v1583_v30 = vadd.f32 %v2784_v61, %v2288_v12 }
 0x798   :  { %v2290_v31 = vpop.f32.mrf.mxu0 }
 0x799   :  { %2719 = vtanh.f32 %v1583_v30  ;;  %v2291_v32 = vadd.f32 %v2290_v31, %v2289_v10 }
 0x79b   :  { %v1588_v33 = vadd.f32 %v2784_v61, %v2291_v32 }
 0x79d   :  { %2721 = vtanh.f32 %v1588_v33 }
 0x7a6   :  { %v2720_v23 = vpop.eup %2719 }
 0x7a7   :  { %1815 = vst [vmem:[%s4056_s12 + $0x10] sm:$0xff] %v2720_v23  ;;  %v1605_v24 = vsel %vm1604_vm0, %v2720_v23, 0.0 }
 0x7a8   :  { %1607 = vadd.xlane.f32.xlu0 %v1605_v24 }
 0x7aa   :  { %v2722_v25 = vpop.eup %2721 }
 0x7ab   :  { %1816 = vst [vmem:[%s4056_s12 + $0x18] sm:$0xff] %v2722_v25  ;;  %v1606_v34 = vsel %vm1604_vm0, %v2722_v25, 0.0 }
 0x7ac   :  { %1609 = vadd.xlane.f32.xlu0 %v1606_v34 }
 0x831   :  { %v1608_v38 = vpop.xlane.xlu0 %1607 }
 0x832   :  { %v1611_v40 = vmul.f32 0.03125, %v1608_v38 }
 0x834   :  { %v1613_v41 = vsub.f32 %v2720_v23, %v1611_v40 }
 0x835   :  { %v1610_v7 = vpop.xlane.xlu0 %1609 }
 0x836   :  { %v1612_v11 = vmul.f32 0.03125, %v1610_v7  ;;  %v1615_v0 = vsel %vm1604_vm0, %v1613_v41, 0.0 }
 0x837   :  { %v1617_v3 = vmul.f32 %v1615_v0, %v1615_v0 }
 0x838   :  { %v1614_v26 = vsub.f32 %v2722_v25, %v1612_v11 }
 0x839   :  { %1619 = vadd.xlane.f32.xlu1 %v1617_v3 }
 0x83a   :  { %v1616_v15 = vsel %vm1604_vm0, %v1614_v26, 0.0 }
 0x83b   :  { %v1618_v16 = vmul.f32 %v1616_v15, %v1616_v15 }
 0x83d   :  { %1621 = vadd.xlane.f32.xlu1 %v1618_v16 }
 0x8c2   :  { %v1620_v49 = vpop.xlane.xlu1 %1619 }
 0x8c3   :  { %v1623_v51 = vmul.f32 0.03125, %v1620_v49 }
 0x8c5   :  { %v1625_v48 = vadd.f32 1e-05, %v1623_v51 }
 0x8c6   :  { %v1622_v53 = vpop.xlane.xlu1 %1621 }
 0x8c7   :  { %2723 = vrsqrt.f32 %v1625_v48  ;;  %v1624_v54 = vmul.f32 0.03125, %v1622_v53 }
 0x8c9   :  { %v1626_v55 = vadd.f32 1e-05, %v1624_v54 }
 0x8cb   :  { %2725 = vrsqrt.f32 %v1626_v55 }
 0x8d4   :  { %v2724_v56 = vpop.eup %2723 }
 0x8d5   :  { %v1629_v57 = vmul.f32 %v2724_v56, %v1615_v0 }
 0x8d7   :  { %v1637_v5 = vmul.f32 %v1817_v58, %v1629_v57 }
 0x8d8   :  { %v2726_v59 = vpop.eup %2725 }
 0x8d9   :  { %v1630_v52 = vmul.f32 %v2726_v59, %v1616_v15  ;;  %v1645_v28 = vadd.f32 %v1818_v19, %v1637_v5 }
 0x8db   :  { %v1638_v27 = vmul.f32 %v1817_v58, %v1630_v52 }
 0x8dd   :  { %v1646_v1 = vadd.f32 %v1818_v19, %v1638_v27 }
 0x8df   :  { %v1647_v29 = vpack.c.bf16 %v1646_v1, %v1645_v28 }
 0x8e1   :  { %2630 = vmatmul.mubr.bf16.vlgmr.msra.gmra.mxu1 %v1647_v29 }
 0x9a1   :  { %v1753_v39 = vpop.f32.mrf.mxu1 }
 0x9a2   :  { %v1754_v42 = vadd.f32 %v1819_v36, %v1753_v39 }
 0x9a3   :  { %v2631_v22 = vpop.f32.mrf.mxu1 }
 0x9a4   :  { %v1761_v60 = vsel %vm1760_vm2, %v1754_v42, -1e+30 }
 0x9a5   :  { %1763 = vmax.xlane.f32.xlu0 %v1761_v60  ;;  %v1756_v61 = vpop.f32.mrf.mxu1 }
 0x9a6   :  { %v1757_v63 = vadd.f32 %v1819_v36, %v1756_v61 }
 0x9a7   :  { %v2632_v2 = vpop.f32.mrf.mxu1 }
 0x9a8   :  { %v1762_v4 = vsel %vm1760_vm2, %v1757_v63, -1e+30 }
 0x9a9   :  { %1765 = vmax.xlane.f32.xlu1 %v1762_v4 }
 0xa2e   :  { %v1764_v6 = vpop.xlane.xlu0 %1763 }
 0xa2f   :  { %v1767_v14 = vsub.f32 %v1761_v60, %v1764_v6 }
 0xa31   :  { %v1769_v17 = vmul.f32 1.442695, %v1767_v14 }
 0xa32   :  { %v1766_v18 = vpop.xlane.xlu1 %1765 }
 0xa33   :  { %2727 = vpow2.f32 %v1769_v17  ;;  %v1768_v13 = vsub.f32 %v1762_v4, %v1766_v18 }
 0xa35   :  { %v1771_v8 = vmul.f32 1.442695, %v1768_v13 }
 0xa37   :  { %2729 = vpow2.f32 %v1771_v8 }
 0xa40   :  { %v2728_v62 = vpop.eup %2727 }
 0xa41   :  { %v1773_v12 = vsel %vm1760_vm2, %v2728_v62, 0.0 }
 0xa42   :  { %1775 = vadd.xlane.f32.xlu0 %v1773_v12 }
 0xa44   :  { %v2730_v10 = vpop.eup %2729 }
 0xa45   :  { %v1774_v30 = vsel %vm1760_vm2, %v2730_v10, 0.0 }
 0xa46   :  { %1777 = vadd.xlane.f32.xlu1 %v1774_v30 }
 0xacb   :  { %v1776_v31 = vpop.xlane.xlu0 %1775 }
 0xacc   :  { %2731 = vlog2.f32 %v1776_v31 }
 0xacf   :  { %v1778_v32 = vpop.xlane.xlu1 %1777 }
 0xad0   :  { %2733 = vlog2.f32 %v1778_v32 }
 0xad9   :  { %v2732_v33 = vpop.eup %2731 }
 0xada   :  { %v1780_v20 = vmul.f32 0.6931472, %v2732_v33 }
 0xadc   :  { %v1783_v23 = vsub.f32 %v1767_v14, %v1780_v20 }
 0xadd   :  { %v2734_v24 = vpop.eup %2733 }
 0xade   :  { %1785 = vst [vmem:[%s4061_s11] sm:$0xff] %v1783_v23  ;;  %v1782_v25 = vmul.f32 0.6931472, %v2734_v24 }
 0xae0   :  { %v1784_v34 = vsub.f32 %v1768_v13, %v1782_v25 }
 0xae2   :  { %1786 = vst [vmem:[%s4061_s11 + $0x8] sm:$0xff] %v1784_v34 }

</bundles_post_ra>
